<compile_context>
chip_gen: v7x
topology: tpu7x:2x2x1
jax: 0.10.0
libtpu: 0.0.40
codegen_flags: <defaults>
</compile_context>

<pallas_src>
import functools

import jax
import jax.numpy as jnp
from jax.experimental import pallas as pl
from jax.experimental.pallas import tpu as pltpu


def rnn_block_kernel(x_ref, wh_ref, wi_ref, b_ref, out_ref, h_scratch, u_scratch):
    """One grid step: a (B_BLK, T_BLK) tile of the (batch, seq) plane."""
    t_blk = pl.program_id(1)

    # h_0 = 0 at the start of every batch block's time sweep.
    @pl.when(t_blk == 0)
    def _():
        h_scratch[...] = jnp.zeros_like(h_scratch)

    bb, tb, in_dim = x_ref.shape
    h_dim = out_ref.shape[-1]
    cd = wh_ref.dtype  # matmul compute dtype (bf16 by default)

    # Hoisted, non-recurrent input projection for the whole time block:
    # one (bb*tb, in_dim) x (in_dim, h_dim) MXU matmul with f32 accumulation.
    # Stored into VMEM scratch (not carried as a live value) so vreg pressure
    # stays flat as tiles grow; per-step reads ride the otherwise-idle vld slots.
    x_flat = x_ref[...].reshape(bb * tb, in_dim).astype(cd)
    u = jnp.dot(x_flat, wi_ref[...], preferred_element_type=jnp.float32)
    u_scratch[...] = (u + b_ref[...]).reshape(bb, tb, h_dim)

    # TODO(synk): overlap the next time block's x @ W_i with this block's
    # recurrence (double-buffered u scratch + manual DMA of x for ti+1) to hide
    # the projection cost entirely behind the serial h @ W_h chain.
    # TODO(synk): drive the recurrent matmul weight-stationary
    # (pltpu.matmul_push_rhs(W_h) once per block, matmul_acc_lhs/pop per step)
    # to remove the per-step RHS push from the serial critical chain.

    # Serial recurrence over the time block (statically unrolled so the
    # scheduler sees the whole chain; only h @ W_h remains per step).
    h = h_scratch[...]                                    # (bb, h_dim) f32 carry
    for i in range(tb):
        z = jnp.dot(h.astype(cd), wh_ref[...], preferred_element_type=jnp.float32)
        h = jnp.tanh(z + u_scratch[:, i, :])              # f32 tanh (EUP), f32 state
        out_ref[:, i, :] = h.astype(out_ref.dtype)        # lane-dense per-step store

    h_scratch[...] = h                                    # carry to next time block


def _round_up(v, m):
    return -(-v // m) * m


def _weight_spec(shape, single_buffer):
    """Grid-invariant (constant) operand spec; optionally single-buffered."""
    index_map = lambda bi, ti: (0,) * len(shape)
    if single_buffer:
        # Constant index_map => never re-DMA'd; Buffered(1) also halves its VMEM.
        return pl.BlockSpec(shape, index_map, pipeline_mode=pl.Buffered(1))
    return pl.BlockSpec(shape, index_map)


@functools.partial(
    jax.jit,
    static_argnames=("compute_dtype", "out_dtype", "t_block", "b_block",
                     "single_buffer_weights"),
)
def _forward(x, hidden_w, input_w, b, *, compute_dtype, out_dtype,
             t_block, b_block, single_buffer_weights):
    batch, seq, input_dim = x.shape
    hidden_dim = hidden_w.shape[0]
    out_dtype = jnp.dtype(x.dtype) if out_dtype is None else jnp.dtype(out_dtype)
    cdt = jnp.dtype(compute_dtype)

    # ---- Tile selection ----------------------------------------------------
    # Lanes (last dims) pad to 128; batch / time-block dims pad to 8. Hidden and
    # input pad only to the next multiple of 128 (extra MXU parallelism comes
    # from M = batch rows, not wasted N/K padding).
    i_pad = _round_up(input_dim, 128)
    h_pad = _round_up(hidden_dim, 128)

    b_aligned = _round_up(batch, 8)
    b_blk = min(_round_up(b_block, 8), b_aligned)
    # Megacore (v7x): keep >= 2 batch blocks when each half still gives M >= 128.
    if b_aligned // b_blk < 2 and b_aligned >= 256:
        b_blk = _round_up(-(-b_aligned // 2), 8)
    b_pad = _round_up(b_aligned, b_blk)

    s_aligned = _round_up(seq, 8)
    t_blk = min(_round_up(t_block, 8), s_aligned)
    s_pad = _round_up(seq, t_blk)

    # ---- Padded operands (skip the extra HBM pass when already aligned) -----
    if x.shape == (b_pad, s_pad, i_pad):
        x_p = x
    else:
        x_p = (jnp.zeros((b_pad, s_pad, i_pad), x.dtype)
               .at[:batch, :seq, :input_dim].set(x))

    # Zero padding keeps padded hidden lanes inert: padded W_h/W_i rows/cols and
    # padded bias lanes are 0, so those lanes stay tanh(0)=0 and never feed back.
    wh_p = (jnp.zeros((h_pad, h_pad), cdt)
            .at[:hidden_dim, :hidden_dim].set(hidden_w.astype(cdt)))
    wi_p = (jnp.zeros((i_pad, h_pad), cdt)
            .at[:input_dim, :hidden_dim].set(input_w.astype(cdt)))
    b_p = jnp.zeros((1, h_pad), jnp.float32).at[0, :hidden_dim].set(
        b.astype(jnp.float32))

    # ---- VMEM budget ---------------------------------------------------------
    wbufs = 1 if single_buffer_weights else 2
    vmem_est = (
        2 * b_blk * t_blk * i_pad * x.dtype.itemsize             # x (double-buffered)
        + 2 * b_blk * t_blk * h_pad * out_dtype.itemsize         # out (double-buffered)
        + wbufs * ((h_pad + i_pad) * h_pad * cdt.itemsize + h_pad * 4)  # W_h, W_i, b
        + b_blk * h_pad * 4                                      # h carry scratch
        + b_blk * t_blk * h_pad * 4                              # u scratch
    )
    # Raise above the 16 MiB (v5e) / 32 MiB (v6e/v7x) scoped defaults with
    # headroom; on v7x (64 MiB physical) shrink b_block/t_block if this trips.
    vmem_limit = int(min(max(vmem_est * 3 // 2 + (2 << 20), 32 << 20), 96 << 20))

    grid = (b_pad // b_blk, s_pad // t_blk)

    out_p = pl.pallas_call(
        rnn_block_kernel,
        out_shape=jax.ShapeDtypeStruct((b_pad, s_pad, h_pad), out_dtype),
        grid_spec=pltpu.PrefetchScalarGridSpec(
            num_scalar_prefetch=0,
            grid=grid,
            in_specs=[
                # x: batch-major, no wrapper transpose; (B_BLK, T_BLK, In) slab.
                pl.BlockSpec((b_blk, t_blk, i_pad), lambda bi, ti: (bi, ti, 0)),
                # Weights / bias: constant, VMEM-resident (optionally 1-buffered).
                _weight_spec((h_pad, h_pad), single_buffer_weights),
                _weight_spec((i_pad, h_pad), single_buffer_weights),
                _weight_spec((1, h_pad), single_buffer_weights),
            ],
            out_specs=pl.BlockSpec((b_blk, t_blk, h_pad),
                                   lambda bi, ti: (bi, ti, 0)),
            scratch_shapes=[
                pltpu.VMEM((b_blk, h_pad), jnp.float32),          # h carry
                pltpu.VMEM((b_blk, t_blk, h_pad), jnp.float32),   # u = x@Wi + b
            ],
        ),
        compiler_params=pltpu.CompilerParams(
            # batch blocks independent (megacore-parallel); time blocks serial
            # (hidden state carried in VMEM scratch across the time axis).
            dimension_semantics=("parallel", "arbitrary"),
            vmem_limit_bytes=vmem_limit,
        ),
    )(x_p, wh_p, wi_p, b_p)

    if out_p.shape == (batch, seq, hidden_dim):
        return out_p
    return out_p[:batch, :seq, :hidden_dim]


def recurrent_layer_forward(x, hidden_w, input_w, b, *,
                            compute_dtype=jnp.bfloat16, out_dtype=None,
                            t_block=32, b_block=128):
    """x: (batch, seq, input_dim) -> (batch, seq, hidden_dim)."""
    kwargs = dict(compute_dtype=compute_dtype, out_dtype=out_dtype,
                  t_block=t_block, b_block=b_block)
    try:
        return _forward(x, hidden_w, input_w, b,
                        single_buffer_weights=True, **kwargs)
    except Exception:
        # Fallback for JAX versions where BlockSpec(pipeline_mode=Buffered(1))
        # is not supported for grid pipelining; double-buffered weights instead.
        return _forward(x, hidden_w, input_w, b,
                        single_buffer_weights=False, **kwargs)


def reference_forward(x, hidden_w, input_w, b):
    """Pure-JAX f32 reference matching the PyTorch forward."""
    batch, seq, _ = x.shape
    hidden_dim = hidden_w.shape[0]
    h = jnp.zeros((batch, hidden_dim), dtype=jnp.float32)
    hs = []
    for t in range(seq):
        z = h @ hidden_w + x[:, t, :] @ input_w + b
        h = jnp.tanh(z)
        hs.append(h)
    return jnp.stack(hs, axis=1).astype(x.dtype)


def make_params(key, input_dim, hidden_dim):
    """Deterministic init matching the module's __init__ shapes."""
    k1, k2 = jax.random.split(key)
    # orthogonal_ for hidden_w: QR of a random normal matrix
    a = jax.random.normal(k1, (hidden_dim, hidden_dim), dtype=jnp.float32)
    q, r = jnp.linalg.qr(a)
    q = q * jnp.sign(jnp.diagonal(r))
    hidden_w = q
    # xavier_uniform_ for input_w
    limit = jnp.sqrt(6.0 / (input_dim + hidden_dim))
    input_w = jax.random.uniform(
        k2, (input_dim, hidden_dim), dtype=jnp.float32, minval=-limit, maxval=limit
    )
    b = jnp.zeros((hidden_dim,), dtype=jnp.float32)
    return hidden_w, input_w, b


def _check(batch, seq, input_dim, hidden_dim, key, *, compute_dtype,
           t_block=32, b_block=128, atol=1e-4, rtol=1e-4):
    kx, kp = jax.random.split(key)
    x = jax.random.normal(kx, (batch, seq, input_dim), dtype=jnp.float32)
    hidden_w, input_w, b = make_params(kp, input_dim, hidden_dim)
    ref = reference_forward(x, hidden_w, input_w, b)
    out = recurrent_layer_forward(x, hidden_w, input_w, b,
                                  compute_dtype=compute_dtype,
                                  t_block=t_block, b_block=b_block)
    out = jax.block_until_ready(out)
    assert out.shape == (batch, seq, hidden_dim)
    assert jnp.allclose(out, ref, atol=atol, rtol=rtol), (
        f"mismatch: batch={batch} seq={seq} in={input_dim} hid={hidden_dim} "
        f"dtype={compute_dtype}")


if __name__ == "__main__":
    keys = jax.random.split(jax.random.PRNGKey(0), 3)

    # 1) Module-sized example: f32 path (tight tolerance), then bf16 fast path.
    _check(2, 8, 4, 32, keys[0], compute_dtype=jnp.float32, atol=1e-5, rtol=1e-5)
    _check(2, 8, 4, 32, keys[0], compute_dtype=jnp.bfloat16, atol=5e-2, rtol=5e-2)

    # 2) Multiple time blocks + multiple batch blocks: exercises the VMEM
    #    hidden-state carry across the "arbitrary" time axis and the t==0 reset.
    _check(10, 24, 4, 32, keys[1], compute_dtype=jnp.float32,
           t_block=8, b_block=8, atol=5e-4, rtol=5e-4)

    # 3) Fully tile-aligned shapes: exercises the no-padding-copy fast path.
    _check(8, 16, 128, 128, keys[2], compute_dtype=jnp.float32,
           t_block=8, b_block=8, atol=5e-4, rtol=5e-4)

    print("KERNEL_OK")
</pallas_src>

<mosaic_0001>
module attributes {stable_mosaic.version = 11 : i64} {
  func.func @rnn_block_kernel(%arg0: i32, %arg1: i32, %arg2: memref<8x8x128xf32, #tpu.memory_space<vmem>>, %arg3: memref<128x128xf32, #tpu.memory_space<vmem>>, %arg4: memref<128x128xf32, #tpu.memory_space<vmem>>, %arg5: memref<1x128xf32, #tpu.memory_space<vmem>>, %arg6: memref<8x8x128xf32, #tpu.memory_space<vmem>>, %arg7: memref<8x128xf32, #tpu.memory_space<vmem>>, %arg8: memref<8x8x128xf32, #tpu.memory_space<vmem>>) attributes {dimension_semantics = [#tpu.dimension_semantics<parallel>, #tpu.dimension_semantics<arbitrary>], iteration_bounds = array<i64: 1, 1>, scalar_prefetch = 0 : i64, scratch_operands = 2 : i64, tpu.core_type = #tpu.core_type<tc>, window_params = [{transform_indices = @transform_0, window_bounds = array<i64: 8, 8, 128>}, {pipeline_mode = #tpu.pipeline_mode<synchronous>, transform_indices = @transform_1, window_bounds = array<i64: 128, 128>}, {pipeline_mode = #tpu.pipeline_mode<synchronous>, transform_indices = @transform_2, window_bounds = array<i64: 128, 128>}, {pipeline_mode = #tpu.pipeline_mode<synchronous>, transform_indices = @transform_3, window_bounds = array<i64: 1, 128>}, {transform_indices = @transform_4, window_bounds = array<i64: 8, 8, 128>}]} {
    %c0_i32 = arith.constant 0 : i32
    %0 = arith.cmpi eq, %arg1, %c0_i32 : i32
    %1 = arith.extui %0 : i1 to i32
    %c0_i32_0 = arith.constant 0 : i32
    %2 = arith.cmpi ne, %1, %c0_i32_0 : i32
    scf.if %2 {
      %cst_79 = arith.constant 0.000000e+00 : f32
      %86 = vector.broadcast %cst_79 : f32 to vector<8x128xf32>
      %c0_80 = arith.constant 0 : index
      %c0_81 = arith.constant 0 : index
      %87 = vector.load %arg7[%c0_80, %c0_81] : memref<8x128xf32, #tpu.memory_space<vmem>>, vector<8x128xf32>
      tpu.vector_store %arg7[%c0_80, %c0_81], %86 {strides = array<i32>} : memref<8x128xf32, #tpu.memory_space<vmem>>, vector<8x128xf32>,
    } else {
    }
    %c0 = arith.constant 0 : index
    %c0_1 = arith.constant 0 : index
    %c0_2 = arith.constant 0 : index
    %3 = vector.load %arg2[%c0, %c0_1, %c0_2] : memref<8x8x128xf32, #tpu.memory_space<vmem>>, vector<8x8x128xf32>
    %4 = vector.shape_cast %3 : vector<8x8x128xf32> to vector<64x128xf32>
    %c0_3 = arith.constant 0 : index
    %c0_4 = arith.constant 0 : index
    %5 = vector.load %arg4[%c0_3, %c0_4] : memref<128x128xf32, #tpu.memory_space<vmem>>, vector<128x128xf32>
    %cst = arith.constant dense<0.000000e+00> : vector<64x128xf32>
    %6 = tpu.matmul %4, %5, %cst {dimension_numbers = #tpu.dot_dimension_numbers<[1], [0], [0], [1], [0, 0, 1, 1], [], []>} : vector<64x128xf32>, vector<128x128xf32>, vector<64x128xf32> -> vector<64x128xf32>
    %c0_5 = arith.constant 0 : index
    %c0_6 = arith.constant 0 : index
    %7 = vector.load %arg5[%c0_5, %c0_6] : memref<1x128xf32, #tpu.memory_space<vmem>>, vector<1x128xf32>
    %8 = vector.broadcast %7 : vector<1x128xf32> to vector<64x128xf32>
    %9 = arith.addf %6, %8 : vector<64x128xf32>
    %10 = vector.shape_cast %9 : vector<64x128xf32> to vector<8x8x128xf32>
    %c0_7 = arith.constant 0 : index
    %c0_8 = arith.constant 0 : index
    %c0_9 = arith.constant 0 : index
    %11 = vector.load %arg8[%c0_7, %c0_8, %c0_9] : memref<8x8x128xf32, #tpu.memory_space<vmem>>, vector<8x8x128xf32>
    tpu.vector_store %arg8[%c0_7, %c0_8, %c0_9], %10 {strides = array<i32>} : memref<8x8x128xf32, #tpu.memory_space<vmem>>, vector<8x8x128xf32>,
    %c0_10 = arith.constant 0 : index
    %c0_11 = arith.constant 0 : index
    %12 = vector.load %arg7[%c0_10, %c0_11] : memref<8x128xf32, #tpu.memory_space<vmem>>, vector<8x128xf32>
    %c0_12 = arith.constant 0 : index
    %c0_13 = arith.constant 0 : index
    %13 = vector.load %arg3[%c0_12, %c0_13] : memref<128x128xf32, #tpu.memory_space<vmem>>, vector<128x128xf32>
    %cst_14 = arith.constant dense<0.000000e+00> : vector<8x128xf32>
    %14 = tpu.matmul %12, %13, %cst_14 {dimension_numbers = #tpu.dot_dimension_numbers<[1], [0], [0], [1], [0, 0, 1, 1], [], []>} : vector<8x128xf32>, vector<128x128xf32>, vector<8x128xf32> -> vector<8x128xf32>
    %c0_15 = arith.constant 0 : index
    %c0_16 = arith.constant 0 : index
    %c0_17 = arith.constant 0 : index
    %15 = vector.load %arg8[%c0_15, %c0_16, %c0_17] : memref<8x8x128xf32, #tpu.memory_space<vmem>>, vector<8x1x128xf32>
    %16 = vector.shape_cast %15 : vector<8x1x128xf32> to vector<8x128xf32>
    %17 = arith.addf %14, %16 : vector<8x128xf32>
    %18 = math.tanh %17 : vector<8x128xf32>
    %c0_18 = arith.constant 0 : index
    %c0_19 = arith.constant 0 : index
    %c0_20 = arith.constant 0 : index
    %19 = vector.load %arg6[%c0_18, %c0_19, %c0_20] : memref<8x8x128xf32, #tpu.memory_space<vmem>>, vector<8x1x128xf32>
    %20 = vector.shape_cast %19 : vector<8x1x128xf32> to vector<8x128xf32>
    %21 = vector.shape_cast %18 : vector<8x128xf32> to vector<8x1x128xf32>
    tpu.vector_store %arg6[%c0_18, %c0_19, %c0_20], %21 {strides = array<i32>} : memref<8x8x128xf32, #tpu.memory_space<vmem>>, vector<8x1x128xf32>,
    %c0_21 = arith.constant 0 : index
    %c0_22 = arith.constant 0 : index
    %22 = vector.load %arg3[%c0_21, %c0_22] : memref<128x128xf32, #tpu.memory_space<vmem>>, vector<128x128xf32>
    %cst_23 = arith.constant dense<0.000000e+00> : vector<8x128xf32>
    %23 = tpu.matmul %18, %22, %cst_23 {dimension_numbers = #tpu.dot_dimension_numbers<[1], [0], [0], [1], [0, 0, 1, 1], [], []>} : vector<8x128xf32>, vector<128x128xf32>, vector<8x128xf32> -> vector<8x128xf32>
    %c0_24 = arith.constant 0 : index
    %c1 = arith.constant 1 : index
    %c0_25 = arith.constant 0 : index
    %24 = vector.load %arg8[%c0_24, %c1, %c0_25] : memref<8x8x128xf32, #tpu.memory_space<vmem>>, vector<8x1x128xf32>
    %25 = vector.shape_cast %24 : vector<8x1x128xf32> to vector<8x128xf32>
    %26 = arith.addf %23, %25 : vector<8x128xf32>
    %27 = math.tanh %26 : vector<8x128xf32>
    %c0_26 = arith.constant 0 : index
    %c1_27 = arith.constant 1 : index
    %c0_28 = arith.constant 0 : index
    %28 = vector.load %arg6[%c0_26, %c1_27, %c0_28] : memref<8x8x128xf32, #tpu.memory_space<vmem>>, vector<8x1x128xf32>
    %29 = vector.shape_cast %28 : vector<8x1x128xf32> to vector<8x128xf32>
    %30 = vector.shape_cast %27 : vector<8x128xf32> to vector<8x1x128xf32>
    tpu.vector_store %arg6[%c0_26, %c1_27, %c0_28], %30 {strides = array<i32>} : memref<8x8x128xf32, #tpu.memory_space<vmem>>, vector<8x1x128xf32>,
    %c0_29 = arith.constant 0 : index
    %c0_30 = arith.constant 0 : index
    %31 = vector.load %arg3[%c0_29, %c0_30] : memref<128x128xf32, #tpu.memory_space<vmem>>, vector<128x128xf32>
    %cst_31 = arith.constant dense<0.000000e+00> : vector<8x128xf32>
    %32 = tpu.matmul %27, %31, %cst_31 {dimension_numbers = #tpu.dot_dimension_numbers<[1], [0], [0], [1], [0, 0, 1, 1], [], []>} : vector<8x128xf32>, vector<128x128xf32>, vector<8x128xf32> -> vector<8x128xf32>
    %c0_32 = arith.constant 0 : index
    %c2 = arith.constant 2 : index
    %c0_33 = arith.constant 0 : index
    %33 = vector.load %arg8[%c0_32, %c2, %c0_33] : memref<8x8x128xf32, #tpu.memory_space<vmem>>, vector<8x1x128xf32>
    %34 = vector.shape_cast %33 : vector<8x1x128xf32> to vector<8x128xf32>
    %35 = arith.addf %32, %34 : vector<8x128xf32>
    %36 = math.tanh %35 : vector<8x128xf32>
    %c0_34 = arith.constant 0 : index
    %c2_35 = arith.constant 2 : index
    %c0_36 = arith.constant 0 : index
    %37 = vector.load %arg6[%c0_34, %c2_35, %c0_36] : memref<8x8x128xf32, #tpu.memory_space<vmem>>, vector<8x1x128xf32>
    %38 = vector.shape_cast %37 : vector<8x1x128xf32> to vector<8x128xf32>
    %39 = vector.shape_cast %36 : vector<8x128xf32> to vector<8x1x128xf32>
    tpu.vector_store %arg6[%c0_34, %c2_35, %c0_36], %39 {strides = array<i32>} : memref<8x8x128xf32, #tpu.memory_space<vmem>>, vector<8x1x128xf32>,
    %c0_37 = arith.constant 0 : index
    %c0_38 = arith.constant 0 : index
    %40 = vector.load %arg3[%c0_37, %c0_38] : memref<128x128xf32, #tpu.memory_space<vmem>>, vector<128x128xf32>
    %cst_39 = arith.constant dense<0.000000e+00> : vector<8x128xf32>
    %41 = tpu.matmul %36, %40, %cst_39 {dimension_numbers = #tpu.dot_dimension_numbers<[1], [0], [0], [1], [0, 0, 1, 1], [], []>} : vector<8x128xf32>, vector<128x128xf32>, vector<8x128xf32> -> vector<8x128xf32>
    %c0_40 = arith.constant 0 : index
    %c3 = arith.constant 3 : index
    %c0_41 = arith.constant 0 : index
    %42 = vector.load %arg8[%c0_40, %c3, %c0_41] : memref<8x8x128xf32, #tpu.memory_space<vmem>>, vector<8x1x128xf32>
    %43 = vector.shape_cast %42 : vector<8x1x128xf32> to vector<8x128xf32>
    %44 = arith.addf %41, %43 : vector<8x128xf32>
    %45 = math.tanh %44 : vector<8x128xf32>
    %c0_42 = arith.constant 0 : index
    %c3_43 = arith.constant 3 : index
    %c0_44 = arith.constant 0 : index
    %46 = vector.load %arg6[%c0_42, %c3_43, %c0_44] : memref<8x8x128xf32, #tpu.memory_space<vmem>>, vector<8x1x128xf32>
    %47 = vector.shape_cast %46 : vector<8x1x128xf32> to vector<8x128xf32>
    %48 = vector.shape_cast %45 : vector<8x128xf32> to vector<8x1x128xf32>
    tpu.vector_store %arg6[%c0_42, %c3_43, %c0_44], %48 {strides = array<i32>} : memref<8x8x128xf32, #tpu.memory_space<vmem>>, vector<8x1x128xf32>,
    %c0_45 = arith.constant 0 : index
    %c0_46 = arith.constant 0 : index
    %49 = vector.load %arg3[%c0_45, %c0_46] : memref<128x128xf32, #tpu.memory_space<vmem>>, vector<128x128xf32>
    %cst_47 = arith.constant dense<0.000000e+00> : vector<8x128xf32>
    %50 = tpu.matmul %45, %49, %cst_47 {dimension_numbers = #tpu.dot_dimension_numbers<[1], [0], [0], [1], [0, 0, 1, 1], [], []>} : vector<8x128xf32>, vector<128x128xf32>, vector<8x128xf32> -> vector<8x128xf32>
    %c0_48 = arith.constant 0 : index
    %c4 = arith.constant 4 : index
    %c0_49 = arith.constant 0 : index
    %51 = vector.load %arg8[%c0_48, %c4, %c0_49] : memref<8x8x128xf32, #tpu.memory_space<vmem>>, vector<8x1x128xf32>
    %52 = vector.shape_cast %51 : vector<8x1x128xf32> to vector<8x128xf32>
    %53 = arith.addf %50, %52 : vector<8x128xf32>
    %54 = math.tanh %53 : vector<8x128xf32>
    %c0_50 = arith.constant 0 : index
    %c4_51 = arith.constant 4 : index
    %c0_52 = arith.constant 0 : index
    %55 = vector.load %arg6[%c0_50, %c4_51, %c0_52] : memref<8x8x128xf32, #tpu.memory_space<vmem>>, vector<8x1x128xf32>
    %56 = vector.shape_cast %55 : vector<8x1x128xf32> to vector<8x128xf32>
    %57 = vector.shape_cast %54 : vector<8x128xf32> to vector<8x1x128xf32>
    tpu.vector_store %arg6[%c0_50, %c4_51, %c0_52], %57 {strides = array<i32>} : memref<8x8x128xf32, #tpu.memory_space<vmem>>, vector<8x1x128xf32>,
    %c0_53 = arith.constant 0 : index
    %c0_54 = arith.constant 0 : index
    %58 = vector.load %arg3[%c0_53, %c0_54] : memref<128x128xf32, #tpu.memory_space<vmem>>, vector<128x128xf32>
    %cst_55 = arith.constant dense<0.000000e+00> : vector<8x128xf32>
    %59 = tpu.matmul %54, %58, %cst_55 {dimension_numbers = #tpu.dot_dimension_numbers<[1], [0], [0], [1], [0, 0, 1, 1], [], []>} : vector<8x128xf32>, vector<128x128xf32>, vector<8x128xf32> -> vector<8x128xf32>
    %c0_56 = arith.constant 0 : index
    %c5 = arith.constant 5 : index
    %c0_57 = arith.constant 0 : index
    %60 = vector.load %arg8[%c0_56, %c5, %c0_57] : memref<8x8x128xf32, #tpu.memory_space<vmem>>, vector<8x1x128xf32>
    %61 = vector.shape_cast %60 : vector<8x1x128xf32> to vector<8x128xf32>
    %62 = arith.addf %59, %61 : vector<8x128xf32>
    %63 = math.tanh %62 : vector<8x128xf32>
    %c0_58 = arith.constant 0 : index
    %c5_59 = arith.constant 5 : index
    %c0_60 = arith.constant 0 : index
    %64 = vector.load %arg6[%c0_58, %c5_59, %c0_60] : memref<8x8x128xf32, #tpu.memory_space<vmem>>, vector<8x1x128xf32>
    %65 = vector.shape_cast %64 : vector<8x1x128xf32> to vector<8x128xf32>
    %66 = vector.shape_cast %63 : vector<8x128xf32> to vector<8x1x128xf32>
    tpu.vector_store %arg6[%c0_58, %c5_59, %c0_60], %66 {strides = array<i32>} : memref<8x8x128xf32, #tpu.memory_space<vmem>>, vector<8x1x128xf32>,
    %c0_61 = arith.constant 0 : index
    %c0_62 = arith.constant 0 : index
    %67 = vector.load %arg3[%c0_61, %c0_62] : memref<128x128xf32, #tpu.memory_space<vmem>>, vector<128x128xf32>
    %cst_63 = arith.constant dense<0.000000e+00> : vector<8x128xf32>
    %68 = tpu.matmul %63, %67, %cst_63 {dimension_numbers = #tpu.dot_dimension_numbers<[1], [0], [0], [1], [0, 0, 1, 1], [], []>} : vector<8x128xf32>, vector<128x128xf32>, vector<8x128xf32> -> vector<8x128xf32>
    %c0_64 = arith.constant 0 : index
    %c6 = arith.constant 6 : index
    %c0_65 = arith.constant 0 : index
    %69 = vector.load %arg8[%c0_64, %c6, %c0_65] : memref<8x8x128xf32, #tpu.memory_space<vmem>>, vector<8x1x128xf32>
    %70 = vector.shape_cast %69 : vector<8x1x128xf32> to vector<8x128xf32>
    %71 = arith.addf %68, %70 : vector<8x128xf32>
    %72 = math.tanh %71 : vector<8x128xf32>
    %c0_66 = arith.constant 0 : index
    %c6_67 = arith.constant 6 : index
    %c0_68 = arith.constant 0 : index
    %73 = vector.load %arg6[%c0_66, %c6_67, %c0_68] : memref<8x8x128xf32, #tpu.memory_space<vmem>>, vector<8x1x128xf32>
    %74 = vector.shape_cast %73 : vector<8x1x128xf32> to vector<8x128xf32>
    %75 = vector.shape_cast %72 : vector<8x128xf32> to vector<8x1x128xf32>
    tpu.vector_store %arg6[%c0_66, %c6_67, %c0_68], %75 {strides = array<i32>} : memref<8x8x128xf32, #tpu.memory_space<vmem>>, vector<8x1x128xf32>,
    %c0_69 = arith.constant 0 : index
    %c0_70 = arith.constant 0 : index
    %76 = vector.load %arg3[%c0_69, %c0_70] : memref<128x128xf32, #tpu.memory_space<vmem>>, vector<128x128xf32>
    %cst_71 = arith.constant dense<0.000000e+00> : vector<8x128xf32>
    %77 = tpu.matmul %72, %76, %cst_71 {dimension_numbers = #tpu.dot_dimension_numbers<[1], [0], [0], [1], [0, 0, 1, 1], [], []>} : vector<8x128xf32>, vector<128x128xf32>, vector<8x128xf32> -> vector<8x128xf32>
    %c0_72 = arith.constant 0 : index
    %c7 = arith.constant 7 : index
    %c0_73 = arith.constant 0 : index
    %78 = vector.load %arg8[%c0_72, %c7, %c0_73] : memref<8x8x128xf32, #tpu.memory_space<vmem>>, vector<8x1x128xf32>
    %79 = vector.shape_cast %78 : vector<8x1x128xf32> to vector<8x128xf32>
    %80 = arith.addf %77, %79 : vector<8x128xf32>
    %81 = math.tanh %80 : vector<8x128xf32>
    %c0_74 = arith.constant 0 : index
    %c7_75 = arith.constant 7 : index
    %c0_76 = arith.constant 0 : index
    %82 = vector.load %arg6[%c0_74, %c7_75, %c0_76] : memref<8x8x128xf32, #tpu.memory_space<vmem>>, vector<8x1x128xf32>
    %83 = vector.shape_cast %82 : vector<8x1x128xf32> to vector<8x128xf32>
    %84 = vector.shape_cast %81 : vector<8x128xf32> to vector<8x1x128xf32>
    tpu.vector_store %arg6[%c0_74, %c7_75, %c0_76], %84 {strides = array<i32>} : memref<8x8x128xf32, #tpu.memory_space<vmem>>, vector<8x1x128xf32>,
    %c0_77 = arith.constant 0 : index
    %c0_78 = arith.constant 0 : index
    %85 = vector.load %arg7[%c0_77, %c0_78] : memref<8x128xf32, #tpu.memory_space<vmem>>, vector<8x128xf32>
    tpu.vector_store %arg7[%c0_77, %c0_78], %81 {strides = array<i32>} : memref<8x128xf32, #tpu.memory_space<vmem>>, vector<8x128xf32>,
    return
  }
  func.func @transform_0(%arg0: i32, %arg1: i32) -> (i32, i32, i32) {
    %c0_i32 = arith.constant 0 : i32
    %c0_i32_0 = arith.constant 0 : i32
    return %arg0, %arg1, %c0_i32 : i32, i32, i32
  }
  func.func @transform_1(%arg0: i32, %arg1: i32) -> (i32, i32) {
    %c0_i32 = arith.constant 0 : i32
    %c0_i32_0 = arith.constant 0 : i32
    %c0_i32_1 = arith.constant 0 : i32
    return %c0_i32, %c0_i32_0 : i32, i32
  }
  func.func @transform_2(%arg0: i32, %arg1: i32) -> (i32, i32) {
    %c0_i32 = arith.constant 0 : i32
    %c0_i32_0 = arith.constant 0 : i32
    %c0_i32_1 = arith.constant 0 : i32
    return %c0_i32, %c0_i32_0 : i32, i32
  }
  func.func @transform_3(%arg0: i32, %arg1: i32) -> (i32, i32) {
    %c0_i32 = arith.constant 0 : i32
    %c0_i32_0 = arith.constant 0 : i32
    %c0_i32_1 = arith.constant 0 : i32
    return %c0_i32, %c0_i32_0 : i32, i32
  }
  func.func @transform_4(%arg0: i32, %arg1: i32) -> (i32, i32, i32) {
    %c0_i32 = arith.constant 0 : i32
    %c0_i32_0 = arith.constant 0 : i32
    return %arg0, %arg1, %c0_i32 : i32, i32, i32
  }
}

module attributes {stable_mosaic.version = 11 : i64} {
  func.func @rnn_block_kernel(%arg0: i32, %arg1: i32, %arg2: memref<8x8x128xf32, #tpu.memory_space<vmem>>, %arg3: memref<128x128xf32, #tpu.memory_space<vmem>>, %arg4: memref<128x128xf32, #tpu.memory_space<vmem>>, %arg5: memref<1x128xf32, #tpu.memory_space<vmem>>, %arg6: memref<8x8x128xf32, #tpu.memory_space<vmem>>, %arg7: memref<8x128xf32, #tpu.memory_space<vmem>>, %arg8: memref<8x8x128xf32, #tpu.memory_space<vmem>>) attributes {dimension_semantics = [#tpu.dimension_semantics<parallel>, #tpu.dimension_semantics<arbitrary>], iteration_bounds = array<i64: 1, 1>, scalar_prefetch = 0 : i64, scratch_operands = 2 : i64, tpu.core_type = #tpu.core_type<tc>, window_params = [{transform_indices = @transform_0, window_bounds = array<i64: 8, 8, 128>}, {pipeline_mode = #tpu.pipeline_mode<synchronous>, transform_indices = @transform_1, window_bounds = array<i64: 128, 128>}, {pipeline_mode = #tpu.pipeline_mode<synchronous>, transform_indices = @transform_2, window_bounds = array<i64: 128, 128>}, {pipeline_mode = #tpu.pipeline_mode<synchronous>, transform_indices = @transform_3, window_bounds = array<i64: 1, 128>}, {transform_indices = @transform_4, window_bounds = array<i64: 8, 8, 128>}]} {
    %c0_i32 = arith.constant 0 : i32
    %0 = arith.cmpi eq, %arg1, %c0_i32 : i32
    %1 = arith.extui %0 : i1 to i32
    %c0_i32_0 = arith.constant 0 : i32
    %2 = arith.cmpi ne, %1, %c0_i32_0 : i32
    scf.if %2 {
      %cst_79 = arith.constant 0.000000e+00 : f32
      %86 = vector.broadcast %cst_79 : f32 to vector<8x128xf32>
      %c0_80 = arith.constant 0 : index
      %c0_81 = arith.constant 0 : index
      %87 = vector.load %arg7[%c0_80, %c0_81] : memref<8x128xf32, #tpu.memory_space<vmem>>, vector<8x128xf32>
      tpu.vector_store %arg7[%c0_80, %c0_81], %86 {strides = array<i32>} : memref<8x128xf32, #tpu.memory_space<vmem>>, vector<8x128xf32>,
    } else {
    }
    %c0 = arith.constant 0 : index
    %c0_1 = arith.constant 0 : index
    %c0_2 = arith.constant 0 : index
    %3 = vector.load %arg2[%c0, %c0_1, %c0_2] : memref<8x8x128xf32, #tpu.memory_space<vmem>>, vector<8x8x128xf32>
    %4 = vector.shape_cast %3 : vector<8x8x128xf32> to vector<64x128xf32>
    %c0_3 = arith.constant 0 : index
    %c0_4 = arith.constant 0 : index
    %5 = vector.load %arg4[%c0_3, %c0_4] : memref<128x128xf32, #tpu.memory_space<vmem>>, vector<128x128xf32>
    %cst = arith.constant dense<0.000000e+00> : vector<64x128xf32>
    %6 = tpu.matmul %4, %5, %cst {dimension_numbers = #tpu.dot_dimension_numbers<[1], [0], [0], [1], [0, 0, 1, 1], [], []>} : vector<64x128xf32>, vector<128x128xf32>, vector<64x128xf32> -> vector<64x128xf32>
    %c0_5 = arith.constant 0 : index
    %c0_6 = arith.constant 0 : index
    %7 = vector.load %arg5[%c0_5, %c0_6] : memref<1x128xf32, #tpu.memory_space<vmem>>, vector<1x128xf32>
    %8 = vector.broadcast %7 : vector<1x128xf32> to vector<64x128xf32>
    %9 = arith.addf %6, %8 : vector<64x128xf32>
    %10 = vector.shape_cast %9 : vector<64x128xf32> to vector<8x8x128xf32>
    %c0_7 = arith.constant 0 : index
    %c0_8 = arith.constant 0 : index
    %c0_9 = arith.constant 0 : index
    %11 = vector.load %arg8[%c0_7, %c0_8, %c0_9] : memref<8x8x128xf32, #tpu.memory_space<vmem>>, vector<8x8x128xf32>
    tpu.vector_store %arg8[%c0_7, %c0_8, %c0_9], %10 {strides = array<i32>} : memref<8x8x128xf32, #tpu.memory_space<vmem>>, vector<8x8x128xf32>,
    %c0_10 = arith.constant 0 : index
    %c0_11 = arith.constant 0 : index
    %12 = vector.load %arg7[%c0_10, %c0_11] : memref<8x128xf32, #tpu.memory_space<vmem>>, vector<8x128xf32>
    %c0_12 = arith.constant 0 : index
    %c0_13 = arith.constant 0 : index
    %13 = vector.load %arg3[%c0_12, %c0_13] : memref<128x128xf32, #tpu.memory_space<vmem>>, vector<128x128xf32>
    %cst_14 = arith.constant dense<0.000000e+00> : vector<8x128xf32>
    %14 = tpu.matmul %12, %13, %cst_14 {dimension_numbers = #tpu.dot_dimension_numbers<[1], [0], [0], [1], [0, 0, 1, 1], [], []>} : vector<8x128xf32>, vector<128x128xf32>, vector<8x128xf32> -> vector<8x128xf32>
    %c0_15 = arith.constant 0 : index
    %c0_16 = arith.constant 0 : index
    %c0_17 = arith.constant 0 : index
    %15 = vector.load %arg8[%c0_15, %c0_16, %c0_17] : memref<8x8x128xf32, #tpu.memory_space<vmem>>, vector<8x1x128xf32>
    %16 = vector.shape_cast %15 : vector<8x1x128xf32> to vector<8x128xf32>
    %17 = arith.addf %14, %16 : vector<8x128xf32>
    %18 = math.tanh %17 : vector<8x128xf32>
    %c0_18 = arith.constant 0 : index
    %c0_19 = arith.constant 0 : index
    %c0_20 = arith.constant 0 : index
    %19 = vector.load %arg6[%c0_18, %c0_19, %c0_20] : memref<8x8x128xf32, #tpu.memory_space<vmem>>, vector<8x1x128xf32>
    %20 = vector.shape_cast %19 : vector<8x1x128xf32> to vector<8x128xf32>
    %21 = vector.shape_cast %18 : vector<8x128xf32> to vector<8x1x128xf32>
    tpu.vector_store %arg6[%c0_18, %c0_19, %c0_20], %21 {strides = array<i32>} : memref<8x8x128xf32, #tpu.memory_space<vmem>>, vector<8x1x128xf32>,
    %c0_21 = arith.constant 0 : index
    %c0_22 = arith.constant 0 : index
    %22 = vector.load %arg3[%c0_21, %c0_22] : memref<128x128xf32, #tpu.memory_space<vmem>>, vector<128x128xf32>
    %cst_23 = arith.constant dense<0.000000e+00> : vector<8x128xf32>
    %23 = tpu.matmul %18, %22, %cst_23 {dimension_numbers = #tpu.dot_dimension_numbers<[1], [0], [0], [1], [0, 0, 1, 1], [], []>} : vector<8x128xf32>, vector<128x128xf32>, vector<8x128xf32> -> vector<8x128xf32>
    %c0_24 = arith.constant 0 : index
    %c1 = arith.constant 1 : index
    %c0_25 = arith.constant 0 : index
    %24 = vector.load %arg8[%c0_24, %c1, %c0_25] : memref<8x8x128xf32, #tpu.memory_space<vmem>>, vector<8x1x128xf32>
    %25 = vector.shape_cast %24 : vector<8x1x128xf32> to vector<8x128xf32>
    %26 = arith.addf %23, %25 : vector<8x128xf32>
    %27 = math.tanh %26 : vector<8x128xf32>
    %c0_26 = arith.constant 0 : index
    %c1_27 = arith.constant 1 : index
    %c0_28 = arith.constant 0 : index
    %28 = vector.load %arg6[%c0_26, %c1_27, %c0_28] : memref<8x8x128xf32, #tpu.memory_space<vmem>>, vector<8x1x128xf32>
    %29 = vector.shape_cast %28 : vector<8x1x128xf32> to vector<8x128xf32>
    %30 = vector.shape_cast %27 : vector<8x128xf32> to vector<8x1x128xf32>
    tpu.vector_store %arg6[%c0_26, %c1_27, %c0_28], %30 {strides = array<i32>} : memref<8x8x128xf32, #tpu.memory_space<vmem>>, vector<8x1x128xf32>,
    %c0_29 = arith.constant 0 : index
    %c0_30 = arith.constant 0 : index
    %31 = vector.load %arg3[%c0_29, %c0_30] : memref<128x128xf32, #tpu.memory_space<vmem>>, vector<128x128xf32>
    %cst_31 = arith.constant dense<0.000000e+00> : vector<8x128xf32>
    %32 = tpu.matmul %27, %31, %cst_31 {dimension_numbers = #tpu.dot_dimension_numbers<[1], [0], [0], [1], [0, 0, 1, 1], [], []>} : vector<8x128xf32>, vector<128x128xf32>, vector<8x128xf32> -> vector<8x128xf32>
    %c0_32 = arith.constant 0 : index
    %c2 = arith.constant 2 : index
    %c0_33 = arith.constant 0 : index
    %33 = vector.load %arg8[%c0_32, %c2, %c0_33] : memref<8x8x128xf32, #tpu.memory_space<vmem>>, vector<8x1x128xf32>
    %34 = vector.shape_cast %33 : vector<8x1x128xf32> to vector<8x128xf32>
    %35 = arith.addf %32, %34 : vector<8x128xf32>
    %36 = math.tanh %35 : vector<8x128xf32>
    %c0_34 = arith.constant 0 : index
    %c2_35 = arith.constant 2 : index
    %c0_36 = arith.constant 0 : index
    %37 = vector.load %arg6[%c0_34, %c2_35, %c0_36] : memref<8x8x128xf32, #tpu.memory_space<vmem>>, vector<8x1x128xf32>
    %38 = vector.shape_cast %37 : vector<8x1x128xf32> to vector<8x128xf32>
    %39 = vector.shape_cast %36 : vector<8x128xf32> to vector<8x1x128xf32>
    tpu.vector_store %arg6[%c0_34, %c2_35, %c0_36], %39 {strides = array<i32>} : memref<8x8x128xf32, #tpu.memory_space<vmem>>, vector<8x1x128xf32>,
    %c0_37 = arith.constant 0 : index
    %c0_38 = arith.constant 0 : index
    %40 = vector.load %arg3[%c0_37, %c0_38] : memref<128x128xf32, #tpu.memory_space<vmem>>, vector<128x128xf32>
    %cst_39 = arith.constant dense<0.000000e+00> : vector<8x128xf32>
    %41 = tpu.matmul %36, %40, %cst_39 {dimension_numbers = #tpu.dot_dimension_numbers<[1], [0], [0], [1], [0, 0, 1, 1], [], []>} : vector<8x128xf32>, vector<128x128xf32>, vector<8x128xf32> -> vector<8x128xf32>
    %c0_40 = arith.constant 0 : index
    %c3 = arith.constant 3 : index
    %c0_41 = arith.constant 0 : index
    %42 = vector.load %arg8[%c0_40, %c3, %c0_41] : memref<8x8x128xf32, #tpu.memory_space<vmem>>, vector<8x1x128xf32>
    %43 = vector.shape_cast %42 : vector<8x1x128xf32> to vector<8x128xf32>
    %44 = arith.addf %41, %43 : vector<8x128xf32>
    %45 = math.tanh %44 : vector<8x128xf32>
    %c0_42 = arith.constant 0 : index
    %c3_43 = arith.constant 3 : index
    %c0_44 = arith.constant 0 : index
    %46 = vector.load %arg6[%c0_42, %c3_43, %c0_44] : memref<8x8x128xf32, #tpu.memory_space<vmem>>, vector<8x1x128xf32>
    %47 = vector.shape_cast %46 : vector<8x1x128xf32> to vector<8x128xf32>
    %48 = vector.shape_cast %45 : vector<8x128xf32> to vector<8x1x128xf32>
    tpu.vector_store %arg6[%c0_42, %c3_43, %c0_44], %48 {strides = array<i32>} : memref<8x8x128xf32, #tpu.memory_space<vmem>>, vector<8x1x128xf32>,
    %c0_45 = arith.constant 0 : index
    %c0_46 = arith.constant 0 : index
    %49 = vector.load %arg3[%c0_45, %c0_46] : memref<128x128xf32, #tpu.memory_space<vmem>>, vector<128x128xf32>
    %cst_47 = arith.constant dense<0.000000e+00> : vector<8x128xf32>
    %50 = tpu.matmul %45, %49, %cst_47 {dimension_numbers = #tpu.dot_dimension_numbers<[1], [0], [0], [1], [0, 0, 1, 1], [], []>} : vector<8x128xf32>, vector<128x128xf32>, vector<8x128xf32> -> vector<8x128xf32>
    %c0_48 = arith.constant 0 : index
    %c4 = arith.constant 4 : index
    %c0_49 = arith.constant 0 : index
    %51 = vector.load %arg8[%c0_48, %c4, %c0_49] : memref<8x8x128xf32, #tpu.memory_space<vmem>>, vector<8x1x128xf32>
    %52 = vector.shape_cast %51 : vector<8x1x128xf32> to vector<8x128xf32>
    %53 = arith.addf %50, %52 : vector<8x128xf32>
    %54 = math.tanh %53 : vector<8x128xf32>
    %c0_50 = arith.constant 0 : index
    %c4_51 = arith.constant 4 : index
    %c0_52 = arith.constant 0 : index
    %55 = vector.load %arg6[%c0_50, %c4_51, %c0_52] : memref<8x8x128xf32, #tpu.memory_space<vmem>>, vector<8x1x128xf32>
    %56 = vector.shape_cast %55 : vector<8x1x128xf32> to vector<8x128xf32>
    %57 = vector.shape_cast %54 : vector<8x128xf32> to vector<8x1x128xf32>
    tpu.vector_store %arg6[%c0_50, %c4_51, %c0_52], %57 {strides = array<i32>} : memref<8x8x128xf32, #tpu.memory_space<vmem>>, vector<8x1x128xf32>,
    %c0_53 = arith.constant 0 : index
    %c0_54 = arith.constant 0 : index
    %58 = vector.load %arg3[%c0_53, %c0_54] : memref<128x128xf32, #tpu.memory_space<vmem>>, vector<128x128xf32>
    %cst_55 = arith.constant dense<0.000000e+00> : vector<8x128xf32>
    %59 = tpu.matmul %54, %58, %cst_55 {dimension_numbers = #tpu.dot_dimension_numbers<[1], [0], [0], [1], [0, 0, 1, 1], [], []>} : vector<8x128xf32>, vector<128x128xf32>, vector<8x128xf32> -> vector<8x128xf32>
    %c0_56 = arith.constant 0 : index
    %c5 = arith.constant 5 : index
    %c0_57 = arith.constant 0 : index
    %60 = vector.load %arg8[%c0_56, %c5, %c0_57] : memref<8x8x128xf32, #tpu.memory_space<vmem>>, vector<8x1x128xf32>
    %61 = vector.shape_cast %60 : vector<8x1x128xf32> to vector<8x128xf32>
    %62 = arith.addf %59, %61 : vector<8x128xf32>
    %63 = math.tanh %62 : vector<8x128xf32>
    %c0_58 = arith.constant 0 : index
    %c5_59 = arith.constant 5 : index
    %c0_60 = arith.constant 0 : index
    %64 = vector.load %arg6[%c0_58, %c5_59, %c0_60] : memref<8x8x128xf32, #tpu.memory_space<vmem>>, vector<8x1x128xf32>
    %65 = vector.shape_cast %64 : vector<8x1x128xf32> to vector<8x128xf32>
    %66 = vector.shape_cast %63 : vector<8x128xf32> to vector<8x1x128xf32>
    tpu.vector_store %arg6[%c0_58, %c5_59, %c0_60], %66 {strides = array<i32>} : memref<8x8x128xf32, #tpu.memory_space<vmem>>, vector<8x1x128xf32>,
    %c0_61 = arith.constant 0 : index
    %c0_62 = arith.constant 0 : index
    %67 = vector.load %arg3[%c0_61, %c0_62] : memref<128x128xf32, #tpu.memory_space<vmem>>, vector<128x128xf32>
    %cst_63 = arith.constant dense<0.000000e+00> : vector<8x128xf32>
    %68 = tpu.matmul %63, %67, %cst_63 {dimension_numbers = #tpu.dot_dimension_numbers<[1], [0], [0], [1], [0, 0, 1, 1], [], []>} : vector<8x128xf32>, vector<128x128xf32>, vector<8x128xf32> -> vector<8x128xf32>
    %c0_64 = arith.constant 0 : index
    %c6 = arith.constant 6 : index
    %c0_65 = arith.constant 0 : index
    %69 = vector.load %arg8[%c0_64, %c6, %c0_65] : memref<8x8x128xf32, #tpu.memory_space<vmem>>, vector<8x1x128xf32>
    %70 = vector.shape_cast %69 : vector<8x1x128xf32> to vector<8x128xf32>
    %71 = arith.addf %68, %70 : vector<8x128xf32>
    %72 = math.tanh %71 : vector<8x128xf32>
    %c0_66 = arith.constant 0 : index
    %c6_67 = arith.constant 6 : index
    %c0_68 = arith.constant 0 : index
    %73 = vector.load %arg6[%c0_66, %c6_67, %c0_68] : memref<8x8x128xf32, #tpu.memory_space<vmem>>, vector<8x1x128xf32>
    %74 = vector.shape_cast %73 : vector<8x1x128xf32> to vector<8x128xf32>
    %75 = vector.shape_cast %72 : vector<8x128xf32> to vector<8x1x128xf32>
    tpu.vector_store %arg6[%c0_66, %c6_67, %c0_68], %75 {strides = array<i32>} : memref<8x8x128xf32, #tpu.memory_space<vmem>>, vector<8x1x128xf32>,
    %c0_69 = arith.constant 0 : index
    %c0_70 = arith.constant 0 : index
    %76 = vector.load %arg3[%c0_69, %c0_70] : memref<128x128xf32, #tpu.memory_space<vmem>>, vector<128x128xf32>
    %cst_71 = arith.constant dense<0.000000e+00> : vector<8x128xf32>
    %77 = tpu.matmul %72, %76, %cst_71 {dimension_numbers = #tpu.dot_dimension_numbers<[1], [0], [0], [1], [0, 0, 1, 1], [], []>} : vector<8x128xf32>, vector<128x128xf32>, vector<8x128xf32> -> vector<8x128xf32>
    %c0_72 = arith.constant 0 : index
    %c7 = arith.constant 7 : index
    %c0_73 = arith.constant 0 : index
    %78 = vector.load %arg8[%c0_72, %c7, %c0_73] : memref<8x8x128xf32, #tpu.memory_space<vmem>>, vector<8x1x128xf32>
    %79 = vector.shape_cast %78 : vector<8x1x128xf32> to vector<8x128xf32>
    %80 = arith.addf %77, %79 : vector<8x128xf32>
    %81 = math.tanh %80 : vector<8x128xf32>
    %c0_74 = arith.constant 0 : index
    %c7_75 = arith.constant 7 : index
    %c0_76 = arith.constant 0 : index
    %82 = vector.load %arg6[%c0_74, %c7_75, %c0_76] : memref<8x8x128xf32, #tpu.memory_space<vmem>>, vector<8x1x128xf32>
    %83 = vector.shape_cast %82 : vector<8x1x128xf32> to vector<8x128xf32>
    %84 = vector.shape_cast %81 : vector<8x128xf32> to vector<8x1x128xf32>
    tpu.vector_store %arg6[%c0_74, %c7_75, %c0_76], %84 {strides = array<i32>} : memref<8x8x128xf32, #tpu.memory_space<vmem>>, vector<8x1x128xf32>,
    %c0_77 = arith.constant 0 : index
    %c0_78 = arith.constant 0 : index
    %85 = vector.load %arg7[%c0_77, %c0_78] : memref<8x128xf32, #tpu.memory_space<vmem>>, vector<8x128xf32>
    tpu.vector_store %arg7[%c0_77, %c0_78], %81 {strides = array<i32>} : memref<8x128xf32, #tpu.memory_space<vmem>>, vector<8x128xf32>,
    return
  }
  func.func @transform_0(%arg0: i32, %arg1: i32) -> (i32, i32, i32) {
    %c0_i32 = arith.constant 0 : i32
    %c0_i32_0 = arith.constant 0 : i32
    return %arg0, %arg1, %c0_i32 : i32, i32, i32
  }
  func.func @transform_1(%arg0: i32, %arg1: i32) -> (i32, i32) {
    %c0_i32 = arith.constant 0 : i32
    %c0_i32_0 = arith.constant 0 : i32
    %c0_i32_1 = arith.constant 0 : i32
    return %c0_i32, %c0_i32_0 : i32, i32
  }
  func.func @transform_2(%arg0: i32, %arg1: i32) -> (i32, i32) {
    %c0_i32 = arith.constant 0 : i32
    %c0_i32_0 = arith.constant 0 : i32
    %c0_i32_1 = arith.constant 0 : i32
    return %c0_i32, %c0_i32_0 : i32, i32
  }
  func.func @transform_3(%arg0: i32, %arg1: i32) -> (i32, i32) {
    %c0_i32 = arith.constant 0 : i32
    %c0_i32_0 = arith.constant 0 : i32
    %c0_i32_1 = arith.constant 0 : i32
    return %c0_i32, %c0_i32_0 : i32, i32
  }
  func.func @transform_4(%arg0: i32, %arg1: i32) -> (i32, i32, i32) {
    %c0_i32 = arith.constant 0 : i32
    %c0_i32_0 = arith.constant 0 : i32
    return %arg0, %arg1, %c0_i32 : i32, i32, i32
  }
}

</mosaic_0001>

<bundles_post_ra>
// kernel: _forward.1
= control target key start
LH: loop header
LB: loop body
LE: loop exit
PB: predicated region body
PF: predicated region fallthrough
CT: control target
= control target key end

     0   :  { %v2412_v3 = vmov 0.0|0.0   ;;  %vm2413_vm0 = vmmov 0   ;;  %v2414_v4 = vmov 0.0   ;;  %vm200_vm1 = vcmask 1041409   ;;  %s3082_s2 = inlined_call_operand.vmem [shape: f32[128,128], index: 2, kind: input, shape index: {}]   ;;  %s3083_s1 = inlined_call_operand.vmem [shape: f32[128,128], index: 1, kind: input, shape index: {}]   ;;  %s3084_s0 = inlined_call_operand.vmem [shape: f32[8,8,128], index: 0, kind: input, shape index: {}]   ;;  %s3085_s3 = inlined_call_operand.vmem [shape: f32[1,128], index: 3, kind: input, shape index: {}]   ;;  %s3086_s4 = inlined_call_operand.vmem [shape: f32[8,8,128], index: 4, kind: output, shape index: {}]  }
   0x1   :  { %v30_v0 = vld [vmem:[%s3082_s2] sm:$0xff]  ;;  %v31_v1 = vld [vmem:[%s3082_s2 + $0x8] sm:$0xff]  ;;  %v32_v2 = vld [vmem:[%s3082_s2 + $0x10] sm:$0xff]  ;;  %2200 = vmatprep.subr.bf16.mxu1 %v2412_v3  ;;  %1920 = vmatprep.mubr.msk.f32.mxu1 %vm2413_vm0, %v2414_v4  ;;  %vm203_vm2 = vcmask 1042434   ;;  %vm206_vm3 = vcmask 1043459   ;;  %vm209_vm4 = vcmask 1044484  }
   0x2   :  { %v2168_v5 = vpack.c.bf16 %v31_v1, %v30_v0  ;;  %v33_v6 = vld [vmem:[%s3082_s2 + $0x18] sm:$0xff]  ;;  %v34_v8 = vld [vmem:[%s3082_s2 + $0x20] sm:$0xff]  ;;  %v35_v9 = vld [vmem:[%s3082_s2 + $0x28] sm:$0xff]  ;;  %vm212_vm5 = vcmask 1045509   ;;  %vm215_vm6 = vcmask 1046534   ;;  %vm218_vm7 = vcmask 1047559  }
   0x3   :  { %v2172_v7 = vpack.c.bf16 %v33_v6, %v32_v2  ;;  %v167_v10 = vld [vmem:[%s3083_s1] sm:$0xff]  ;;  %v2176_v11 = vpack.c.bf16 %v35_v9, %v34_v8  ;;  %v36_v12 = vld [vmem:[%s3082_s2 + $0x30] sm:$0xff]  ;;  %v37_v13 = vld [vmem:[%s3082_s2 + $0x38] sm:$0xff] }
   0x4   :  { %2169 = vmatprep.subr.bf16.mxu0 %v2168_v5  ;;  %v168_v14 = vld [vmem:[%s3083_s1 + $0x8] sm:$0xff]  ;;  %v22_v16 = vld [vmem:[%s3084_s0] sm:$0xff]  ;;  %v169_v17 = vld [vmem:[%s3083_s1 + $0x10] sm:$0xff]  ;;  %v2180_v20 = vpack.c.bf16 %v37_v13, %v36_v12 }
   0x5   :  { %2171 = vmatpush3.bf16.msra.mxu0 %v2168_v5  ;;  %v2474_v15 = vpack.c.bf16 %v168_v14, %v167_v10  ;;  %v170_v18 = vld [vmem:[%s3083_s1 + $0x18] sm:$0xff]  ;;  %1876 = vmatprep.mubr.f32.mxu0 %v22_v16  ;;  %v171_v21 = vld [vmem:[%s3083_s1 + $0x20] sm:$0xff]  ;;  %v172_v22 = vld [vmem:[%s3083_s1 + $0x28] sm:$0xff] }
   0x6   :  { %2173 = vmatprep.subr.bf16.mxu0 %v2172_v7  ;;  %v2486_v19 = vpack.c.bf16 %v170_v18, %v169_v17  ;;  %v38_v23 = vld [vmem:[%s3082_s2 + $0x40] sm:$0xff]  ;;  %v39_v24 = vld [vmem:[%s3082_s2 + $0x48] sm:$0xff]  ;;  %v2502_v25 = vpack.c.bf16 %v172_v22, %v171_v21  ;;  %v173_v27 = vld [vmem:[%s3083_s1 + $0x30] sm:$0xff] }
   0x7   :  { %2202 = vmatpush3.bf16.msra.mxu1 %v2474_v15  ;;  %v2184_v26 = vpack.c.bf16 %v39_v24, %v38_v23  ;;  %v174_v28 = vld [vmem:[%s3083_s1 + $0x38] sm:$0xff]  ;;  %v40_v29 = vld [vmem:[%s3082_s2 + $0x50] sm:$0xff]  ;;  %v175_v33 = vld [vmem:[%s3083_s1 + $0x40] sm:$0xff] }
   0x8   :  { %2203 = vmatprep.subr.bf16.mxu1 %v2412_v3  ;;  %v41_v30 = vld [vmem:[%s3082_s2 + $0x58] sm:$0xff]  ;;  %v2518_v31 = vpack.c.bf16 %v174_v28, %v173_v27  ;;  %v176_v34 = vld [vmem:[%s3083_s1 + $0x48] sm:$0xff]  ;;  %v42_v35 = vld [vmem:[%s3082_s2 + $0x60] sm:$0xff] }
   0x9   :  { %2175 = vmatpush3.bf16.msra.mxu0 %v2172_v7  ;;  %v2188_v32 = vpack.c.bf16 %v41_v30, %v40_v29  ;;  %v43_v36 = vld [vmem:[%s3082_s2 + $0x68] sm:$0xff]  ;;  %v2534_v37 = vpack.c.bf16 %v176_v34, %v175_v33  ;;  %v177_v39 = vld [vmem:[%s3083_s1 + $0x50] sm:$0xff]  ;;  %v178_v40 = vld [vmem:[%s3083_s1 + $0x58] sm:$0xff] }
   0xa   :  { %2177 = vmatprep.subr.bf16.mxu0 %v2176_v11  ;;  %v2192_v38 = vpack.c.bf16 %v43_v36, %v42_v35  ;;  %v44_v41 = vld [vmem:[%s3082_s2 + $0x70] sm:$0xff]  ;;  %v45_v42 = vld [vmem:[%s3082_s2 + $0x78] sm:$0xff]  ;;  %v2550_v43 = vpack.c.bf16 %v178_v40, %v177_v39  ;;  %v179_v45 = vld [vmem:[%s3083_s1 + $0x60] sm:$0xff] }
   0xb   :  { %2205 = vmatpush3.bf16.msra.mxu1 %v2486_v19  ;;  %v2196_v44 = vpack.c.bf16 %v45_v42, %v44_v41  ;;  %v180_v46 = vld [vmem:[%s3083_s1 + $0x68] sm:$0xff]  ;;  %v181_v48 = vld [vmem:[%s3083_s1 + $0x70] sm:$0xff]  ;;  %v182_v49 = vld [vmem:[%s3083_s1 + $0x78] sm:$0xff] }
   0xc   :  { %2206 = vmatprep.subr.bf16.mxu1 %v2412_v3  ;;  %v2560_v47 = vpack.c.bf16 %v180_v46, %v179_v45  ;;  %v23_v50 = vld [vmem:[%s3084_s0 + $0x8] sm:$0xff]  ;;  %v2573_v51 = vpack.c.bf16 %v182_v49, %v181_v48  ;;  %v24_v52 = vld [vmem:[%s3084_s0 + $0x10] sm:$0xff]  ;;  %v25_v53 = vld [vmem:[%s3084_s0 + $0x18] sm:$0xff] }
   0xd   :  { %2179 = vmatpush3.bf16.msra.mxu0 %v2176_v11  ;;  %v26_v54 = vld [vmem:[%s3084_s0 + $0x20] sm:$0xff]  ;;  %v27_v55 = vld [vmem:[%s3084_s0 + $0x28] sm:$0xff]  ;;  %v28_v56 = vld [vmem:[%s3084_s0 + $0x30] sm:$0xff] }
   0xe   :  { %2181 = vmatprep.subr.bf16.mxu0 %v2180_v20  ;;  %v29_v57 = vld [vmem:[%s3084_s0 + $0x38] sm:$0xff]  ;;  %v1651_v58 = vld [vmem:[%s3085_s3] ss:$0 sm:$0xff] }
   0xf   :  { %2208 = vmatpush3.bf16.msra.mxu1 %v2502_v25 }
  0x10   :  { %2209 = vmatprep.subr.bf16.mxu1 %v2412_v3 }
  0x11   :  { %2183 = vmatpush3.bf16.msra.mxu0 %v2180_v20 }
  0x12   :  { %2185 = vmatprep.subr.bf16.mxu0 %v2184_v26 }
  0x13   :  { %2211 = vmatpush3.bf16.msra.mxu1 %v2518_v31 }
  0x14   :  { %2212 = vmatprep.subr.bf16.mxu1 %v2412_v3 }
  0x15   :  { %2187 = vmatpush3.bf16.msra.mxu0 %v2184_v26 }
  0x16   :  { %2189 = vmatprep.subr.bf16.mxu0 %v2188_v32 }
  0x17   :  { %2214 = vmatpush3.bf16.msra.mxu1 %v2534_v37 }
  0x18   :  { %2215 = vmatprep.subr.bf16.mxu1 %v2412_v3 }
  0x19   :  { %2191 = vmatpush3.bf16.msra.mxu0 %v2188_v32 }
  0x1a   :  { %2193 = vmatprep.subr.bf16.mxu0 %v2192_v38 }
  0x1b   :  { %2217 = vmatpush3.bf16.msra.mxu1 %v2550_v43 }
  0x1c   :  { %2218 = vmatprep.subr.bf16.mxu1 %v2412_v3 }
  0x1d   :  { %2195 = vmatpush3.bf16.msra.mxu0 %v2192_v38 }
  0x1e   :  { %2197 = vmatprep.subr.bf16.mxu0 %v2196_v44 }
  0x1f   :  { %2220 = vmatpush3.bf16.msra.mxu1 %v2560_v47 }
  0x20   :  { %2221 = vmatprep.subr.bf16.mxu1 %v2412_v3 }
  0x21   :  { %2199 = vmatpush3.bf16.msra.mxu0 %v2196_v44 }
  0x22   :  { %2224 = vmatprep.subr.bf16.mxu0 %v2412_v3 }
  0x23   :  { %2223 = vmatpush3.bf16.msra.mxu1 %v2573_v51 }
  0x24   :  { %1877 = vmatmul.mubr.f32.vlgmr.msra.gmra.mrb[0].mxu0 %v23_v50  ;;  %2248 = vmatprep.subr.bf16.mxu1 %v2412_v3 }
  0x25   :  { %1879 = vmatprep.mubr.f32.mxu0 %v24_v52  ;;  %2226 = vmatpush3.bf16.msra.mxu0 %v2474_v15  ;;  %v2415_v52 = vmov 1966171168  }
  0x26   :  { %2227 = vmatprep.subr.bf16.mxu0 %v2412_v3  ;;  %1921 = vmatmul.mubr.f32.vlgmr.msra.gmra.mrb[0].mxu1 %v2414_v4 }
  0x27   :  { %2250 = vmatpush3.bf16.msra.mxu1 %v2474_v15  ;;  %1990 = vmatprep.mubr.msk.f32.mxu1 %vm2413_vm0, %v2414_v4 }
  0x28   :  { %1880 = vmatmul.mubr.f32.gmra.mrb[2].mxu0 %v25_v53  ;;  %2251 = vmatprep.subr.bf16.mxu1 %v2412_v3  ;;  %v2642_v53 = vunpack.c.l.s4 %v2415_v52 }
  0x29   :  { %1882 = vmatprep.mubr.f32.mxu0 %v26_v54  ;;  %2229 = vmatpush3.bf16.msra.mxu0 %v2486_v19 }
  0x2a   :  { %2230 = vmatprep.subr.bf16.mxu0 %v2412_v3 }
  0x2b   :  { %2253 = vmatpush3.bf16.msra.mxu1 %v2486_v19 }
  0x2c   :  { %1883 = vmatmul.mubr.f32.gmra.mrb[4].mxu0 %v27_v55  ;;  %2254 = vmatprep.subr.bf16.mxu1 %v2412_v3 }
  0x2d   :  { %1885 = vmatprep.mubr.f32.mxu0 %v28_v56  ;;  %2232 = vmatpush3.bf16.msra.mxu0 %v2502_v25 }
  0x2e   :  { %2233 = vmatprep.subr.bf16.mxu0 %v2412_v3 }
  0x2f   :  { %2256 = vmatpush3.bf16.msra.mxu1 %v2502_v25 }
  0x30   :  { %1886 = vmatmul.mubr.f32.gmra.mrb[6].mxu0 %v29_v57  ;;  %2257 = vmatprep.subr.bf16.mxu1 %v2412_v3 }
  0x31   :  { %1955 = vmatprep.mubr.msk.f32.mxu0 %vm2413_vm0, %v2414_v4  ;;  %2235 = vmatpush3.bf16.msra.mxu0 %v2518_v31 }
  0x32   :  { %2236 = vmatprep.subr.bf16.mxu0 %v2412_v3 }
  0x33   :  { %2259 = vmatpush3.bf16.msra.mxu1 %v2518_v31 }
  0x34   :  { %2260 = vmatprep.subr.bf16.mxu1 %v2412_v3 }
  0x35   :  { %2238 = vmatpush3.bf16.msra.mxu0 %v2534_v37 }
  0x36   :  { %2239 = vmatprep.subr.bf16.mxu0 %v2412_v3 }
  0x37   :  { %2262 = vmatpush3.bf16.msra.mxu1 %v2534_v37 }
  0x38   :  { %2263 = vmatprep.subr.bf16.mxu1 %v2412_v3 }
  0x39   :  { %2241 = vmatpush3.bf16.msra.mxu0 %v2550_v43 }
  0x3a   :  { %2242 = vmatprep.subr.bf16.mxu0 %v2412_v3 }
  0x3b   :  { %2265 = vmatpush3.bf16.msra.mxu1 %v2550_v43 }
  0x3c   :  { %2266 = vmatprep.subr.bf16.mxu1 %v2412_v3 }
  0x3d   :  { %2244 = vmatpush3.bf16.msra.mxu0 %v2560_v47 }
  0x3e   :  { %2245 = vmatprep.subr.bf16.mxu0 %v2412_v3 }
  0x3f   :  { %2268 = vmatpush3.bf16.msra.mxu1 %v2560_v47 }
  0x40   :  { %2269 = vmatprep.subr.bf16.mxu1 %v2412_v3 }
  0x41   :  { %2247 = vmatpush3.bf16.msra.mxu0 %v2573_v51 }
  0x42   :  { %2272 = vmatprep.subr.bf16.mxu0 %v2412_v3 }
  0x43   :  { %2271 = vmatpush3.bf16.msra.mxu1 %v2573_v51 }
  0x44   :  { %2296 = vmatprep.subr.bf16.mxu1 %v2412_v3 }
  0xf7   :  { %v1878_v59 = vpop.f32.mrb[0].mxu0 }
  0xf8   :  { %v125_v60 = vadd.f32 %v1878_v59, %v1651_v58  ;;  %v119_v61 = vpop.f32.mrb[1].mxu0 }
  0xf9   :  { %v120_v62 = vadd.f32 %v1651_v58, %v119_v61  ;;  %v2637_v0 = vpop.f32.mrb[0].mxu1 }
  0xfa   :  { %159 = vst [vmem:[#allocation3 + $0x8] sm:$0xff] %v125_v60  ;;  %v1922_v5 = vpop.f32.mrb[1].mxu1 }
  0xfb   :  { %158 = vst [vmem:[#allocation3] sm:$0xff] %v120_v62  ;;  %v1881_v63 = vpop.f32.mrb[2].mxu0 }
  0xfc   :  { %v135_v1 = vadd.f32 %v1881_v63, %v1651_v58  ;;  %v129_v2 = vpop.f32.mrb[3].mxu0 }
  0xfd   :  { %v130_v6 = vadd.f32 %v1651_v58, %v129_v2 }
  0xfe   :  { %161 = vst [vmem:[#allocation3 + $0x18] sm:$0xff] %v135_v1 }
  0xff   :  { %160 = vst [vmem:[#allocation3 + $0x10] sm:$0xff] %v130_v6  ;;  %v1884_v7 = vpop.f32.mrb[4].mxu0 }
 0x100   :  { %v145_v8 = vadd.f32 %v1884_v7, %v1651_v58  ;;  %v139_v9 = vpop.f32.mrb[5].mxu0 }
 0x101   :  { %v140_v10 = vadd.f32 %v1651_v58, %v139_v9  ;;  %v184_v11 = vld [vmem:[#allocation3 + $0x8] sm:$0x1]  ;;  %v375_v12 = vld [vmem:[#allocation3 + $0x9] sm:$0x1]  ;;  %v559_v18 = vld [vmem:[#allocation3 + $0xa] sm:$0x1] }
 0x102   :  { %163 = vst [vmem:[#allocation3 + $0x28] sm:$0xff] %v145_v8  ;;  %v199_v13 = vrot.slane %v184_v11, 7  ;;  %v183_v16 = vld [vmem:[#allocation3] sm:$0x1]  ;;  %v390_v17 = vrot.slane %v375_v12, 7  ;;  %v574_v34 = vrot.slane %v559_v18, 7 }
 0x103   :  { %162 = vst [vmem:[#allocation3 + $0x20] sm:$0xff] %v140_v10  ;;  %v1887_v14 = vpop.f32.mrb[6].mxu0  ;;  %v374_v22 = vld [vmem:[#allocation3 + $0x1] sm:$0x1]  ;;  %v743_v23 = vld [vmem:[#allocation3 + $0xb] sm:$0x1] }
 0x104   :  { %v155_v20 = vadd.f32 %v1887_v14, %v1651_v58  ;;  %v149_v21 = vpop.f32.mrb[7].mxu0  ;;  %v558_v28 = vld [vmem:[#allocation3 + $0x2] sm:$0x1]  ;;  %v201_v32 = vsel %vm200_vm1, %v199_v13, %v183_v16  ;;  %v391_v38 = vsel %vm200_vm1, %v390_v17, %v374_v22  ;;  %v742_v45 = vld [vmem:[#allocation3 + $0x3] sm:$0x1]  ;;  %v758_v48 = vrot.slane %v743_v23, 7 }
 0x105   :  { %v150_v24 = vadd.f32 %v1651_v58, %v149_v21  ;;  %v186_v26 = vld [vmem:[#allocation3 + $0x18] sm:$0x1]  ;;  %v377_v27 = vld [vmem:[#allocation3 + $0x19] sm:$0x1]  ;;  %v561_v29 = vld [vmem:[#allocation3 + $0x1a] sm:$0x1]  ;;  %v575_v62 = vsel %vm200_vm1, %v574_v34, %v558_v28  ;;  %v297_v17 = vlaneseq }
 0x106   :  { %165 = vst [vmem:[#allocation3 + $0x38] sm:$0xff] %v155_v20  ;;  %v185_v30 = vld [vmem:[#allocation3 + $0x10] sm:$0x1]  ;;  %v376_v33 = vld [vmem:[#allocation3 + $0x11] sm:$0x1]  ;;  %v205_v36 = vrot.slane %v186_v26, 5  ;;  %v759_v22 = vsel %vm200_vm1, %v758_v48, %v742_v45 }
 0x107   :  { %164 = vst [vmem:[#allocation3 + $0x30] sm:$0xff] %v150_v24  ;;  %v202_v35 = vrot.slane %v185_v30, 6  ;;  %v392_v39 = vrot.slane %v376_v33, 6  ;;  %v560_v40 = vld [vmem:[#allocation3 + $0x12] sm:$0x1]  ;;  %v394_v41 = vrot.slane %v377_v27, 5 }
 0x108   :  { %v576_v42 = vrot.slane %v560_v40, 6  ;;  %v578_v44 = vrot.slane %v561_v29, 5  ;;  %v744_v46 = vld [vmem:[#allocation3 + $0x13] sm:$0x1]  ;;  %v745_v7 = vld [vmem:[#allocation3 + $0x1b] sm:$0x1] }
 0x109   :  { %v188_v49 = vld [vmem:[#allocation3 + $0x28] sm:$0x1]  ;;  %v204_v50 = vsel %vm203_vm2, %v202_v35, %v201_v32  ;;  %v379_v54 = vld [vmem:[#allocation3 + $0x29] sm:$0x1]  ;;  %v393_v55 = vsel %vm203_vm2, %v392_v39, %v391_v38  ;;  %v563_v56 = vld [vmem:[#allocation3 + $0x2a] sm:$0x1] }
 0x10a   :  { %v187_v57 = vld [vmem:[#allocation3 + $0x20] sm:$0x1]  ;;  %v211_v58 = vrot.slane %v188_v49, 3  ;;  %v378_v59 = vld [vmem:[#allocation3 + $0x21] sm:$0x1]  ;;  %v395_v60 = vsel %vm206_vm3, %v394_v41, %v393_v55  ;;  %v398_v61 = vrot.slane %v379_v54, 3  ;;  %v577_v5 = vsel %vm203_vm2, %v576_v42, %v575_v62 }
 0x10b   :  { %v208_v63 = vrot.slane %v187_v57, 4  ;;  %v396_v1 = vrot.slane %v378_v59, 4  ;;  %v562_v2 = vld [vmem:[#allocation3 + $0x22] sm:$0x1]  ;;  %v582_v6 = vrot.slane %v563_v56, 3  ;;  %v207_v8 = vsel %vm206_vm3, %v205_v36, %v204_v50 }
 0x10c   :  { %v579_v9 = vsel %vm206_vm3, %v578_v44, %v577_v5  ;;  %v580_v10 = vrot.slane %v562_v2, 4  ;;  %v746_v11 = vld [vmem:[#allocation3 + $0x23] sm:$0x1]  ;;  %v747_v12 = vld [vmem:[#allocation3 + $0x2b] sm:$0x1]  ;;  %v760_v13 = vrot.slane %v744_v46, 6 }
 0x10d   :  { %v190_v14 = vld [vmem:[#allocation3 + $0x38] sm:$0x1]  ;;  %v210_v16 = vsel %vm209_vm4, %v208_v63, %v207_v8  ;;  %v381_v18 = vld [vmem:[#allocation3 + $0x39] sm:$0x1]  ;;  %v397_v20 = vsel %vm209_vm4, %v396_v1, %v395_v60  ;;  %v565_v21 = vld [vmem:[#allocation3 + $0x3a] sm:$0x1] }
 0x10e   :  { %v189_v23 = vld [vmem:[#allocation3 + $0x30] sm:$0x1]  ;;  %v213_v24 = vsel %vm212_vm5, %v211_v58, %v210_v16  ;;  %v217_v26 = vrot.slane %v190_v14, 1  ;;  %v380_v27 = vld [vmem:[#allocation3 + $0x31] sm:$0x1]  ;;  %v399_v28 = vsel %vm212_vm5, %v398_v61, %v397_v20  ;;  %v402_v29 = vrot.slane %v381_v18, 1 }
 0x10f   :  { %v214_v30 = vrot.slane %v189_v23, 2  ;;  %v400_v32 = vrot.slane %v380_v27, 2  ;;  %v564_v33 = vld [vmem:[#allocation3 + $0x32] sm:$0x1]  ;;  %v581_v34 = vsel %vm209_vm4, %v580_v10, %v579_v9  ;;  %v586_v35 = vrot.slane %v565_v21, 1 }
 0x110   :  { %v583_v36 = vsel %vm212_vm5, %v582_v6, %v581_v34  ;;  %v584_v38 = vrot.slane %v564_v33, 2  ;;  %v748_v39 = vld [vmem:[#allocation3 + $0x33] sm:$0x1]  ;;  %v749_v40 = vld [vmem:[#allocation3 + $0x3b] sm:$0x1]  ;;  %v761_v41 = vsel %vm203_vm2, %v760_v13, %v759_v22  ;;  %v762_v42 = vrot.slane %v745_v7, 5 }
 0x111   :  { %v216_v44 = vsel %vm215_vm6, %v214_v30, %v213_v24  ;;  %v401_v45 = vsel %vm215_vm6, %v400_v32, %v399_v28  ;;  %v764_v46 = vrot.slane %v746_v11, 4  ;;  %v766_v48 = vrot.slane %v747_v12, 3  ;;  %v927_v49 = vld [vmem:[#allocation3 + $0xc] sm:$0x1]  ;;  %v928_v50 = vld [vmem:[#allocation3 + $0x14] sm:$0x1] }
 0x112   :  { %v219_v52 = vsel %vm218_vm7, %v217_v26, %v216_v44  ;;  %v2662_v54 = vsel %vm218_vm7, %v402_v29, %v401_v45  ;;  %v585_v55 = vsel %vm215_vm6, %v584_v38, %v583_v36  ;;  %v763_v56 = vsel %vm206_vm3, %v762_v42, %v761_v41  ;;  %v926_v57 = vld [vmem:[#allocation3 + $0x4] sm:$0x1]  ;;  %v929_v58 = vld [vmem:[#allocation3 + $0x1c] sm:$0x1]  ;;  %v931_v1 = vld [vmem:[#allocation3 + $0x2c] sm:$0x1] }
 0x113   :  { %v930_v59 = vld [vmem:[#allocation3 + $0x24] sm:$0x1]  ;;  %v288_v60 = vadd.f32 %v2637_v0, %v219_v52  ;;  %v2668_v61 = vsel %vm218_vm7, %v586_v35, %v585_v55  ;;  %v765_v62 = vsel %vm209_vm4, %v764_v46, %v763_v56  ;;  %v768_v63 = vrot.slane %v748_v39, 2  ;;  %v932_v2 = vld [vmem:[#allocation3 + $0x34] sm:$0x1] }
 0x114   :  { %v767_v5 = vsel %vm212_vm5, %v766_v48, %v765_v62  ;;  %v770_v6 = vrot.slane %v749_v40, 1  ;;  %v933_v7 = vld [vmem:[#allocation3 + $0x3c] sm:$0x1]  ;;  %v942_v8 = vrot.slane %v927_v49, 7  ;;  %v944_v9 = vrot.slane %v928_v50, 6 }
 0x115   :  { %v1110_v10 = vld [vmem:[#allocation3 + $0x5] sm:$0x1]  ;;  %2396 = vtanh.f32 %v288_v60  ;;  %v296_v11 = vunpack.c.0.s8 %v2642_v53  ;;  %v769_v0 = vsel %vm215_vm6, %v768_v63, %v767_v5  ;;  %v948_v12 = vrot.slane %v930_v59, 4  ;;  %v1111_v13 = vld [vmem:[#allocation3 + $0xd] sm:$0x1] }
 0x116   :  { %v1112_v14 = vld [vmem:[#allocation3 + $0x15] sm:$0x1]  ;;  %v298_v16 = vshrl.u32 %v297_v17, 7  ;;  %v2675_v18 = vsel %vm218_vm7, %v770_v6, %v769_v0  ;;  %v943_v20 = vsel %vm200_vm1, %v942_v8, %v926_v57  ;;  %v946_v21 = vrot.slane %v929_v58, 5  ;;  %v1113_v22 = vld [vmem:[#allocation3 + $0x1d] sm:$0x1] }
 0x117   :  { %v1114_v23 = vld [vmem:[#allocation3 + $0x25] sm:$0x1]  ;;  %v945_v24 = vsel %vm203_vm2, %v944_v9, %v943_v20  ;;  %v950_v26 = vrot.slane %v931_v1, 3  ;;  %v952_v27 = vrot.slane %v932_v2, 2  ;;  %v1116_v28 = vld [vmem:[#allocation3 + $0x35] sm:$0x1] }
 0x118   :  { %v1126_v53 = vrot.slane %v1111_v13, 7  ;;  %v947_v29 = vsel %vm206_vm3, %v946_v21, %v945_v24  ;;  %v1115_v30 = vld [vmem:[#allocation3 + $0x2d] sm:$0x1]  ;;  %v1117_v32 = vld [vmem:[#allocation3 + $0x3d] sm:$0x1]  ;;  %v1128_v33 = vrot.slane %v1112_v14, 6  ;;  %v2684_v49 = vsub.s32 %v296_v11, %v298_v16 }
 0x119   :  { %v1132_v17 = vrot.slane %v1114_v23, 4  ;;  %v949_v34 = vsel %vm209_vm4, %v948_v12, %v947_v29  ;;  %v954_v35 = vrot.slane %v933_v7, 1  ;;  %v1130_v38 = vrot.slane %v1113_v22, 5  ;;  %v1294_v39 = vld [vmem:[#allocation3 + $0x6] sm:$0x1] }
 0x11a   :  { %v1127_v36 = vsel %vm200_vm1, %v1126_v53, %v1110_v10  ;;  %v1295_v40 = vld [vmem:[#allocation3 + $0xe] sm:$0x1]  ;;  %v951_v41 = vsel %vm212_vm5, %v950_v26, %v949_v34  ;;  %v1136_v44 = vrot.slane %v1116_v28, 2  ;;  %v1296_v45 = vld [vmem:[#allocation3 + $0x16] sm:$0x1]  ;;  %v1134_v55 = vrot.slane %v1115_v30, 3 }
 0x11b   :  { %v1129_v42 = vsel %vm203_vm2, %v1128_v33, %v1127_v36  ;;  %v1297_v46 = vld [vmem:[#allocation3 + $0x1e] sm:$0x1]  ;;  %v1310_v48 = vrot.slane %v1295_v40, 7  ;;  %v953_v50 = vsel %vm215_vm6, %v952_v27, %v951_v41  ;;  %v1298_v56 = vld [vmem:[#allocation3 + $0x26] sm:$0x1]  ;;  %v1138_v60 = vrot.slane %v1117_v32, 1 }
 0x11c   :  { %v1131_v52 = vsel %vm206_vm3, %v1130_v38, %v1129_v42  ;;  %v1300_v57 = vld [vmem:[#allocation3 + $0x36] sm:$0x1]  ;;  %v2689_v58 = vsel %vm218_vm7, %v954_v35, %v953_v50  ;;  %v1299_v62 = vld [vmem:[#allocation3 + $0x2e] sm:$0x1]  ;;  %v1312_v63 = vrot.slane %v1296_v45, 6  ;;  %v1314_v5 = vrot.slane %v1297_v46, 5 }
 0x11d   :  { %v1133_v59 = vsel %vm209_vm4, %v1132_v17, %v1131_v52  ;;  %v1311_v2 = vsel %vm200_vm1, %v1310_v48, %v1294_v39  ;;  %v1316_v6 = vrot.slane %v1298_v56, 4  ;;  %v1479_v7 = vld [vmem:[#allocation3 + $0xf] sm:$0x1]  ;;  %v1301_v9 = vld [vmem:[#allocation3 + $0x3e] sm:$0x1]  ;;  %v1320_v11 = vrot.slane %v1300_v57, 2 }
 0x11e   :  { %v1135_v1 = vsel %vm212_vm5, %v1134_v55, %v1133_v59  ;;  %v1313_v10 = vsel %vm203_vm2, %v1312_v63, %v1311_v2  ;;  %v1480_v0 = vld [vmem:[#allocation3 + $0x17] sm:$0x1]  ;;  %v1318_v16 = vrot.slane %v1299_v62, 3  ;;  %v1478_v20 = vld [vmem:[#allocation3 + $0x7] sm:$0x1]  ;;  %v1494_v27 = vrot.slane %v1479_v7, 7 }
 0x11f   :  { %v1137_v8 = vsel %vm215_vm6, %v1136_v44, %v1135_v1  ;;  %v2397_v12 = vpop.eup %2396  ;;  %v1315_v14 = vsel %vm206_vm3, %v1314_v5, %v1313_v10  ;;  %v1481_v24 = vld [vmem:[#allocation3 + $0x1f] sm:$0x1]  ;;  %v1482_v26 = vld [vmem:[#allocation3 + $0x27] sm:$0x1]  ;;  %v1322_v53 = vrot.slane %v1301_v9, 1  ;;  %v1496_v29 = vrot.slane %v1480_v0, 6 }
 0x120   :  { %v2697_v13 = vsel %vm218_vm7, %v1138_v60, %v1137_v8  ;;  %v293_v21 = vcombine.high %v2397_v12, %v2397_v12  ;;  %v300_v22 = vrot.slane %v2397_v12, %v2684_v49  ;;  %1956 = vmatmul.mubr.f32.vlgmr.msra.gmra.mrb[8].mxu0 %v2397_v12  ;;  %v1317_v23 = vsel %vm209_vm4, %v1316_v6, %v1315_v14  ;;  %v1483_v34 = vld [vmem:[#allocation3 + $0x2f] sm:$0x1]  ;;  %v1484_v35 = vld [vmem:[#allocation3 + $0x37] sm:$0x1]  ;;  %v1485_v46 = vld [vmem:[#allocation3 + $0x3f] sm:$0x1] }
 0x121   :  { %2274 = vmatpush3.bf16.msra.mxu0 %v2474_v15  ;;  %2025 = vmatprep.mubr.msk.f32.mxu0 %vm2413_vm0, %v2414_v4  ;;  %v1319_v28 = vsel %vm212_vm5, %v1318_v16, %v1317_v23  ;;  %v1495_v38 = vsel %vm200_vm1, %v1494_v27, %v1478_v20  ;;  %v1498_v39 = vrot.slane %v1481_v24, 5  ;;  %v1500_v40 = vrot.slane %v1482_v26, 4 }
 0x122   :  { %v307_v30 = vrot.slane %v293_v21, %v2684_v49  ;;  %v308_v32 = vcombine.high %v300_v22, %v300_v22  ;;  %v316_v33 = vrot.slane %v300_v22, %v2684_v49  ;;  %1652 = vst.sshfl [vmem:[%s3086_s4] sm:$0x1 pattern:$0x73625140] %v300_v22  ;;  %2275 = vmatprep.subr.bf16.mxu0 %v2412_v3  ;;  %v1502_v50 = vrot.slane %v1483_v34, 3 }
 0x123   :  { %v1321_v17 = vsel %vm215_vm6, %v1320_v11, %v1319_v28  ;;  %v1497_v48 = vsel %vm203_vm2, %v1496_v29, %v1495_v38  ;;  %v1504_v52 = vrot.slane %v1484_v35, 2  ;;  %v1506_v1 = vrot.slane %v1485_v46, 1 }
 0x124   :  { %v2714_v36 = vsel %vm218_vm7, %v1322_v53, %v1321_v17  ;;  %v309_v41 = vcombine.high %v307_v30, %v307_v30  ;;  %v323_v42 = vrot.slane %v307_v30, %v2684_v49  ;;  %v330_v44 = vrot.slane %v308_v32, %v2684_v49  ;;  %1653 = vst.sshfl [vmem:[%s3086_s4 + $0x8] sm:$0x1 pattern:$0x73625140] %v308_v32 }
 0x125   :  { %v338_v45 = vcombine.high %v316_v33, %v316_v33  ;;  %1654 = vst.sshfl [vmem:[%s3086_s4 + $0x20] sm:$0x1 pattern:$0x73625140] %v307_v30  ;;  %2277 = vmatpush3.bf16.msra.mxu0 %v2486_v19  ;;  %v1499_v59 = vsel %vm206_vm3, %v1498_v39, %v1497_v48 }
 0x126   :  { %v337_v55 = vrot.slane %v309_v41, %v2684_v49  ;;  %v339_v56 = vcombine.high %v323_v42, %v323_v42  ;;  %v340_v57 = vcombine.high %v330_v44, %v330_v44  ;;  %1655 = vst.sshfl [vmem:[%s3086_s4 + $0x28] sm:$0x1 pattern:$0x73625140] %v309_v41  ;;  %2278 = vmatprep.subr.bf16.mxu0 %v2412_v3 }
 0x127   :  { %352 = vst [vmem:[%s3086_s4 + $0x10] sm:$0x1] %v338_v45  ;;  %v1501_v60 = vsel %vm209_vm4, %v1500_v40, %v1499_v59  ;;  %v1278_v59 = vld [vmem:[%s3083_s1] sm:$0xff] }
 0x128   :  { %v341_v62 = vcombine.high %v337_v55, %v337_v55  ;;  %353 = vst [vmem:[%s3086_s4 + $0x18] sm:$0x1] %v340_v57  ;;  %356 = vst [vmem:[%s3086_s4 + $0x30] sm:$0x1] %v339_v56  ;;  %v1503_v63 = vsel %vm212_vm5, %v1502_v50, %v1501_v60  ;;  %v1279_v60 = vld [vmem:[%s3083_s1 + $0x8] sm:$0xff] }
 0x129   :  { %2280 = vmatpush3.bf16.msra.mxu0 %v2502_v25  ;;  %v1505_v2 = vsel %vm215_vm6, %v1504_v52, %v1503_v63  ;;  %v2345_v63 = vpack.c.bf16 %v1279_v60, %v1278_v59 }
 0x12a   :  { %357 = vst [vmem:[%s3086_s4 + $0x38] sm:$0x1] %v341_v62  ;;  %2281 = vmatprep.subr.bf16.mxu0 %v2412_v3  ;;  %v2751_v5 = vsel %vm218_vm7, %v1506_v1, %v1505_v2  ;;  %v1280_v62 = vld [vmem:[%s3083_s1 + $0x10] sm:$0xff]  ;;  %v1281_v1 = vld [vmem:[%s3083_s1 + $0x18] sm:$0xff] }
 0x12b   :  { %v2348_v2 = vpack.c.bf16 %v1281_v1, %v1280_v62 }
 0x12d   :  { %2283 = vmatpush3.bf16.msra.mxu0 %v2518_v31 }
 0x12e   :  { %2284 = vmatprep.subr.bf16.mxu0 %v2412_v3 }
 0x131   :  { %2286 = vmatpush3.bf16.msra.mxu0 %v2534_v37 }
 0x132   :  { %2287 = vmatprep.subr.bf16.mxu0 %v2412_v3 }
 0x135   :  { %2289 = vmatpush3.bf16.msra.mxu0 %v2550_v43 }
 0x136   :  { %2290 = vmatprep.subr.bf16.mxu0 %v2412_v3 }
 0x139   :  { %2292 = vmatpush3.bf16.msra.mxu0 %v2560_v47 }
 0x13a   :  { %2293 = vmatprep.subr.bf16.mxu0 %v2412_v3 }
 0x13d   :  { %2295 = vmatpush3.bf16.msra.mxu0 %v2573_v51 }
 0x13e   :  { %2320 = vmatprep.subr.bf16.mxu0 %v2412_v3 }
 0x1f3   :  { %v471_v6 = vpop.f32.mrb[8].mxu0 }
 0x1f4   :  { %v472_v7 = vadd.f32 %v471_v6, %v2662_v54  ;;  %v1957_v8 = vpop.f32.mrb[9].mxu0  ;;  %v1282_v6 = vld [vmem:[%s3083_s1 + $0x20] sm:$0xff] }
 0x1f6   :  { %2398 = vtanh.f32 %v472_v7  ;;  %v1283_v7 = vld [vmem:[%s3083_s1 + $0x28] sm:$0xff] }
 0x1f7   :  { %v2351_v8 = vpack.c.bf16 %v1283_v7, %v1282_v6 }
 0x200   :  { %v2399_v9 = vpop.eup %2398 }
 0x201   :  { %v477_v10 = vcombine.high %v2399_v9, %v2399_v9  ;;  %v484_v11 = vrot.slane %v2399_v9, %v2684_v49  ;;  %1991 = vmatmul.mubr.f32.vlgmr.msra.gmra.mrb[2].mxu1 %v2399_v9  ;;  %v1284_v9 = vld [vmem:[%s3083_s1 + $0x30] sm:$0xff] }
 0x202   :  { %2298 = vmatpush3.bf16.msra.mxu1 %v2474_v15  ;;  %2060 = vmatprep.mubr.msk.f32.mxu1 %vm2413_vm0, %v2414_v4 }
 0x203   :  { %v491_v0 = vrot.slane %v477_v10, %v2684_v49  ;;  %v492_v12 = vcombine.high %v484_v11, %v484_v11  ;;  %v500_v14 = vrot.slane %v484_v11, %v2684_v49  ;;  %1656 = vst.sshfl [vmem:[%s3086_s4 + $0x1] sm:$0x1 pattern:$0x73625140] %v484_v11  ;;  %2299 = vmatprep.subr.bf16.mxu1 %v2412_v3  ;;  %v1285_v10 = vld [vmem:[%s3083_s1 + $0x38] sm:$0xff] }
 0x204   :  { %v2354_v11 = vpack.c.bf16 %v1285_v10, %v1284_v9 }
 0x205   :  { %v493_v54 = vcombine.high %v491_v0, %v491_v0  ;;  %v507_v16 = vrot.slane %v491_v0, %v2684_v49  ;;  %v514_v20 = vrot.slane %v492_v12, %v2684_v49  ;;  %v522_v21 = vcombine.high %v500_v14, %v500_v14  ;;  %1657 = vst.sshfl [vmem:[%s3086_s4 + $0x9] sm:$0x1 pattern:$0x73625140] %v492_v12  ;;  %v1287_v12 = vld [vmem:[%s3083_s1 + $0x48] sm:$0xff] }
 0x206   :  { %1658 = vst.sshfl [vmem:[%s3086_s4 + $0x21] sm:$0x1 pattern:$0x73625140] %v491_v0  ;;  %2301 = vmatpush3.bf16.msra.mxu1 %v2486_v19  ;;  %v1286_v0 = vld [vmem:[%s3083_s1 + $0x40] sm:$0xff] }
 0x207   :  { %v521_v22 = vrot.slane %v493_v54, %v2684_v49  ;;  %v523_v23 = vcombine.high %v507_v16, %v507_v16  ;;  %v524_v24 = vcombine.high %v514_v20, %v514_v20  ;;  %536 = vst [vmem:[%s3086_s4 + $0x11] sm:$0x1] %v522_v21  ;;  %1659 = vst.sshfl [vmem:[%s3086_s4 + $0x29] sm:$0x1 pattern:$0x73625140] %v493_v54  ;;  %2302 = vmatprep.subr.bf16.mxu1 %v2412_v3 }
 0x208   :  { %v2357_v14 = vpack.c.bf16 %v1287_v12, %v1286_v0 }
 0x209   :  { %v525_v26 = vcombine.high %v521_v22, %v521_v22  ;;  %537 = vst [vmem:[%s3086_s4 + $0x19] sm:$0x1] %v524_v24  ;;  %540 = vst [vmem:[%s3086_s4 + $0x31] sm:$0x1] %v523_v23 }
 0x20a   :  { %2304 = vmatpush3.bf16.msra.mxu1 %v2502_v25 }
 0x20b   :  { %541 = vst [vmem:[%s3086_s4 + $0x39] sm:$0x1] %v525_v26  ;;  %2305 = vmatprep.subr.bf16.mxu1 %v2412_v3 }
 0x20e   :  { %2307 = vmatpush3.bf16.msra.mxu1 %v2518_v31 }
 0x20f   :  { %2308 = vmatprep.subr.bf16.mxu1 %v2412_v3 }
 0x212   :  { %2310 = vmatpush3.bf16.msra.mxu1 %v2534_v37 }
 0x213   :  { %2311 = vmatprep.subr.bf16.mxu1 %v2412_v3 }
 0x216   :  { %2313 = vmatpush3.bf16.msra.mxu1 %v2550_v43 }
 0x217   :  { %2314 = vmatprep.subr.bf16.mxu1 %v2412_v3 }
 0x21a   :  { %2316 = vmatpush3.bf16.msra.mxu1 %v2560_v47 }
 0x21b   :  { %2317 = vmatprep.subr.bf16.mxu1 %v2412_v3 }
 0x21e   :  { %2319 = vmatpush3.bf16.msra.mxu1 %v2573_v51 }
 0x21f   :  { %2344 = vmatprep.subr.bf16.mxu1 %v2412_v3 }
 0x2d4   :  { %v655_v27 = vpop.f32.mrb[2].mxu1 }
 0x2d5   :  { %v656_v28 = vadd.f32 %v655_v27, %v2668_v61  ;;  %v1992_v53 = vpop.f32.mrb[3].mxu1 }
 0x2d7   :  { %2400 = vtanh.f32 %v656_v28 }
 0x2e1   :  { %v2401_v29 = vpop.eup %2400 }
 0x2e2   :  { %v661_v30 = vcombine.high %v2401_v29, %v2401_v29  ;;  %v668_v32 = vrot.slane %v2401_v29, %v2684_v49  ;;  %2026 = vmatmul.mubr.f32.vlgmr.msra.gmra.mrb[10].mxu0 %v2401_v29 }
 0x2e3   :  { %2322 = vmatpush3.bf16.msra.mxu0 %v2474_v15  ;;  %2095 = vmatprep.mubr.msk.f32.mxu0 %vm2413_vm0, %v2414_v4 }
 0x2e4   :  { %v675_v33 = vrot.slane %v661_v30, %v2684_v49  ;;  %v676_v17 = vcombine.high %v668_v32, %v668_v32  ;;  %v684_v34 = vrot.slane %v668_v32, %v2684_v49  ;;  %1660 = vst.sshfl [vmem:[%s3086_s4 + $0x2] sm:$0x1 pattern:$0x73625140] %v668_v32  ;;  %2323 = vmatprep.subr.bf16.mxu0 %v2412_v3 }
 0x2e6   :  { %v677_v61 = vcombine.high %v675_v33, %v675_v33  ;;  %v691_v35 = vrot.slane %v675_v33, %v2684_v49  ;;  %v698_v38 = vrot.slane %v676_v17, %v2684_v49  ;;  %v706_v15 = vcombine.high %v684_v34, %v684_v34  ;;  %1661 = vst.sshfl [vmem:[%s3086_s4 + $0xa] sm:$0x1 pattern:$0x73625140] %v676_v17  ;;  %v1288_v17 = vld [vmem:[%s3083_s1 + $0x50] sm:$0xff]  ;;  %v1289_v34 = vld [vmem:[%s3083_s1 + $0x58] sm:$0xff] }
 0x2e7   :  { %1662 = vst.sshfl [vmem:[%s3086_s4 + $0x22] sm:$0x1 pattern:$0x73625140] %v675_v33  ;;  %2325 = vmatpush3.bf16.msra.mxu0 %v2486_v19 }
 0x2e8   :  { %v705_v39 = vrot.slane %v677_v61, %v2684_v49  ;;  %v707_v40 = vcombine.high %v691_v35, %v691_v35  ;;  %v708_v41 = vcombine.high %v698_v38, %v698_v38  ;;  %720 = vst [vmem:[%s3086_s4 + $0x12] sm:$0x1] %v706_v15  ;;  %1663 = vst.sshfl [vmem:[%s3086_s4 + $0x2a] sm:$0x1 pattern:$0x73625140] %v677_v61  ;;  %2326 = vmatprep.subr.bf16.mxu0 %v2412_v3 }
 0x2e9   :  { %v2360_v61 = vpack.c.bf16 %v1289_v34, %v1288_v17  ;;  %v1290_v35 = vld [vmem:[%s3083_s1 + $0x60] sm:$0xff]  ;;  %v1291_v38 = vld [vmem:[%s3083_s1 + $0x68] sm:$0xff] }
 0x2ea   :  { %v709_v42 = vcombine.high %v705_v39, %v705_v39  ;;  %721 = vst [vmem:[%s3086_s4 + $0x1a] sm:$0x1] %v708_v41  ;;  %724 = vst [vmem:[%s3086_s4 + $0x32] sm:$0x1] %v707_v40  ;;  %v2363_v15 = vpack.c.bf16 %v1291_v38, %v1290_v35  ;;  %v1292_v39 = vld [vmem:[%s3083_s1 + $0x70] sm:$0xff]  ;;  %v1293_v40 = vld [vmem:[%s3083_s1 + $0x78] sm:$0xff] }
 0x2eb   :  { %2328 = vmatpush3.bf16.msra.mxu0 %v2502_v25  ;;  %v2366_v41 = vpack.c.bf16 %v1293_v40, %v1292_v39 }
 0x2ec   :  { %725 = vst [vmem:[%s3086_s4 + $0x3a] sm:$0x1] %v709_v42  ;;  %2329 = vmatprep.subr.bf16.mxu0 %v2412_v3 }
 0x2ef   :  { %2331 = vmatpush3.bf16.msra.mxu0 %v2518_v31 }
 0x2f0   :  { %2332 = vmatprep.subr.bf16.mxu0 %v2412_v3 }
 0x2f3   :  { %2334 = vmatpush3.bf16.msra.mxu0 %v2534_v37 }
 0x2f4   :  { %2335 = vmatprep.subr.bf16.mxu0 %v2412_v3 }
 0x2f7   :  { %2337 = vmatpush3.bf16.msra.mxu0 %v2550_v43 }
 0x2f8   :  { %2338 = vmatprep.subr.bf16.mxu0 %v2412_v3 }
 0x2fb   :  { %2340 = vmatpush3.bf16.msra.mxu0 %v2560_v47 }
 0x2fc   :  { %2341 = vmatprep.subr.bf16.mxu0 %v2412_v3 }
 0x2ff   :  { %2343 = vmatpush3.bf16.msra.mxu0 %v2573_v51 }
 0x300   :  { %2368 = vmatprep.subr.bf16.mxu0 %v2412_v3 }
 0x3b5   :  { %v839_v19 = vpop.f32.mrb[10].mxu0 }
 0x3b6   :  { %v840_v25 = vadd.f32 %v839_v19, %v2675_v18  ;;  %v2027_v31 = vpop.f32.mrb[11].mxu0 }
 0x3b8   :  { %2402 = vtanh.f32 %v840_v25 }
 0x3c2   :  { %v2403_v37 = vpop.eup %2402 }
 0x3c3   :  { %v845_v44 = vcombine.high %v2403_v37, %v2403_v37  ;;  %v852_v45 = vrot.slane %v2403_v37, %v2684_v49  ;;  %2061 = vmatmul.mubr.f32.vlgmr.msra.gmra.mrb[4].mxu1 %v2403_v37 }
 0x3c4   :  { %2130 = vmatprep.mubr.msk.f32.mxu1 %vm2413_vm0, %v2414_v4  ;;  %2346 = vmatpush3.bf16.msra.mxu1 %v2345_v63 }
 0x3c5   :  { %v859_v43 = vrot.slane %v845_v44, %v2684_v49  ;;  %v860_v47 = vcombine.high %v852_v45, %v852_v45  ;;  %v868_v51 = vrot.slane %v852_v45, %v2684_v49  ;;  %1664 = vst.sshfl [vmem:[%s3086_s4 + $0x3] sm:$0x1 pattern:$0x73625140] %v852_v45  ;;  %2347 = vmatprep.subr.bf16.mxu1 %v2412_v3 }
 0x3c7   :  { %v861_v18 = vcombine.high %v859_v43, %v859_v43  ;;  %v875_v46 = vrot.slane %v859_v43, %v2684_v49  ;;  %v882_v48 = vrot.slane %v860_v47, %v2684_v49  ;;  %v890_v50 = vcombine.high %v868_v51, %v868_v51  ;;  %1665 = vst.sshfl [vmem:[%s3086_s4 + $0xb] sm:$0x1 pattern:$0x73625140] %v860_v47 }
 0x3c8   :  { %1666 = vst.sshfl [vmem:[%s3086_s4 + $0x23] sm:$0x1 pattern:$0x73625140] %v859_v43  ;;  %2349 = vmatpush3.bf16.msra.mxu1 %v2348_v2 }
 0x3c9   :  { %v889_v52 = vrot.slane %v861_v18, %v2684_v49  ;;  %v891_v55 = vcombine.high %v875_v46, %v875_v46  ;;  %v892_v56 = vcombine.high %v882_v48, %v882_v48  ;;  %904 = vst [vmem:[%s3086_s4 + $0x13] sm:$0x1] %v890_v50  ;;  %1667 = vst.sshfl [vmem:[%s3086_s4 + $0x2b] sm:$0x1 pattern:$0x73625140] %v861_v18  ;;  %2350 = vmatprep.subr.bf16.mxu1 %v2412_v3 }
 0x3cb   :  { %v893_v57 = vcombine.high %v889_v52, %v889_v52  ;;  %905 = vst [vmem:[%s3086_s4 + $0x1b] sm:$0x1] %v892_v56  ;;  %908 = vst [vmem:[%s3086_s4 + $0x33] sm:$0x1] %v891_v55 }
 0x3cc   :  { %2352 = vmatpush3.bf16.msra.mxu1 %v2351_v8 }
 0x3cd   :  { %909 = vst [vmem:[%s3086_s4 + $0x3b] sm:$0x1] %v893_v57  ;;  %2353 = vmatprep.subr.bf16.mxu1 %v2412_v3 }
 0x3d0   :  { %2355 = vmatpush3.bf16.msra.mxu1 %v2354_v11 }
 0x3d1   :  { %2356 = vmatprep.subr.bf16.mxu1 %v2412_v3 }
 0x3d4   :  { %2358 = vmatpush3.bf16.msra.mxu1 %v2357_v14 }
 0x3d5   :  { %2359 = vmatprep.subr.bf16.mxu1 %v2412_v3 }
 0x3d8   :  { %2361 = vmatpush3.bf16.msra.mxu1 %v2360_v61 }
 0x3d9   :  { %2362 = vmatprep.subr.bf16.mxu1 %v2412_v3 }
 0x3dc   :  { %2364 = vmatpush3.bf16.msra.mxu1 %v2363_v15 }
 0x3dd   :  { %2365 = vmatprep.subr.bf16.mxu1 %v2412_v3 }
 0x3e0   :  { %2367 = vmatpush3.bf16.msra.mxu1 %v2366_v41 }
 0x496   :  { %v1023_v54 = vpop.f32.mrb[4].mxu1 }
 0x497   :  { %v1024_v16 = vadd.f32 %v1023_v54, %v2689_v58  ;;  %v2062_v20 = vpop.f32.mrb[5].mxu1 }
 0x499   :  { %2404 = vtanh.f32 %v1024_v16 }
 0x4a3   :  { %v2405_v21 = vpop.eup %2404 }
 0x4a4   :  { %v1029_v22 = vcombine.high %v2405_v21, %v2405_v21  ;;  %v1036_v23 = vrot.slane %v2405_v21, %v2684_v49  ;;  %2096 = vmatmul.mubr.f32.vlgmr.msra.gmra.mrb[12].mxu0 %v2405_v21 }
 0x4a5   :  { %2370 = vmatpush3.bf16.msra.mxu0 %v2345_v63  ;;  %2165 = vmatprep.mubr.msk.f32.mxu0 %vm2413_vm0, %v2414_v4 }
 0x4a6   :  { %v1043_v24 = vrot.slane %v1029_v22, %v2684_v49  ;;  %v1044_v26 = vcombine.high %v1036_v23, %v1036_v23  ;;  %v1052_v27 = vrot.slane %v1036_v23, %v2684_v49  ;;  %1668 = vst.sshfl [vmem:[%s3086_s4 + $0x4] sm:$0x1 pattern:$0x73625140] %v1036_v23  ;;  %2371 = vmatprep.subr.bf16.mxu0 %v2412_v3 }
 0x4a8   :  { %v1045_v58 = vcombine.high %v1043_v24, %v1043_v24  ;;  %v1059_v28 = vrot.slane %v1043_v24, %v2684_v49  ;;  %v1066_v53 = vrot.slane %v1044_v26, %v2684_v49  ;;  %v1074_v29 = vcombine.high %v1052_v27, %v1052_v27  ;;  %1669 = vst.sshfl [vmem:[%s3086_s4 + $0xc] sm:$0x1 pattern:$0x73625140] %v1044_v26 }
 0x4a9   :  { %1670 = vst.sshfl [vmem:[%s3086_s4 + $0x24] sm:$0x1 pattern:$0x73625140] %v1043_v24  ;;  %2373 = vmatpush3.bf16.msra.mxu0 %v2348_v2 }
 0x4aa   :  { %v1073_v4 = vrot.slane %v1045_v58, %v2684_v49  ;;  %v1075_v30 = vcombine.high %v1059_v28, %v1059_v28  ;;  %v1076_v32 = vcombine.high %v1066_v53, %v1066_v53  ;;  %1088 = vst [vmem:[%s3086_s4 + $0x14] sm:$0x1] %v1074_v29  ;;  %1671 = vst.sshfl [vmem:[%s3086_s4 + $0x2c] sm:$0x1 pattern:$0x73625140] %v1045_v58  ;;  %2374 = vmatprep.subr.bf16.mxu0 %v2412_v3 }
 0x4ac   :  { %v1077_v33 = vcombine.high %v1073_v4, %v1073_v4  ;;  %1089 = vst [vmem:[%s3086_s4 + $0x1c] sm:$0x1] %v1076_v32  ;;  %1092 = vst [vmem:[%s3086_s4 + $0x34] sm:$0x1] %v1075_v30 }
 0x4ad   :  { %2376 = vmatpush3.bf16.msra.mxu0 %v2351_v8 }
 0x4ae   :  { %1093 = vst [vmem:[%s3086_s4 + $0x3c] sm:$0x1] %v1077_v33  ;;  %2377 = vmatprep.subr.bf16.mxu0 %v2412_v3 }
 0x4b1   :  { %2379 = vmatpush3.bf16.msra.mxu0 %v2354_v11 }
 0x4b2   :  { %2380 = vmatprep.subr.bf16.mxu0 %v2412_v3 }
 0x4b5   :  { %2382 = vmatpush3.bf16.msra.mxu0 %v2357_v14 }
 0x4b6   :  { %2383 = vmatprep.subr.bf16.mxu0 %v2412_v3 }
 0x4b9   :  { %2385 = vmatpush3.bf16.msra.mxu0 %v2360_v61 }
 0x4ba   :  { %2386 = vmatprep.subr.bf16.mxu0 %v2412_v3 }
 0x4bd   :  { %2388 = vmatpush3.bf16.msra.mxu0 %v2363_v15 }
 0x4be   :  { %2389 = vmatprep.subr.bf16.mxu0 %v2412_v3 }
 0x4c1   :  { %2391 = vmatpush3.bf16.msra.mxu0 %v2366_v41 }
 0x577   :  { %v1207_v42 = vpop.f32.mrb[12].mxu0 }
 0x578   :  { %v1208_v19 = vadd.f32 %v1207_v42, %v2697_v13  ;;  %v2097_v25 = vpop.f32.mrb[13].mxu0 }
 0x57a   :  { %2406 = vtanh.f32 %v1208_v19 }
 0x584   :  { %v2407_v31 = vpop.eup %2406 }
 0x585   :  { %v1213_v37 = vcombine.high %v2407_v31, %v2407_v31  ;;  %v1220_v44 = vrot.slane %v2407_v31, %v2684_v49  ;;  %2131 = vmatmul.mubr.f32.vlgmr.msra.gmra.mrb[6].mxu1 %v2407_v31 }
 0x587   :  { %v1227_v45 = vrot.slane %v1213_v37, %v2684_v49  ;;  %v1228_v43 = vcombine.high %v1220_v44, %v1220_v44  ;;  %v1236_v47 = vrot.slane %v1220_v44, %v2684_v49  ;;  %1672 = vst.sshfl [vmem:[%s3086_s4 + $0x5] sm:$0x1 pattern:$0x73625140] %v1220_v44 }
 0x589   :  { %v1229_v3 = vcombine.high %v1227_v45, %v1227_v45  ;;  %v1243_v51 = vrot.slane %v1227_v45, %v2684_v49  ;;  %v1250_v13 = vrot.slane %v1228_v43, %v2684_v49  ;;  %v1258_v18 = vcombine.high %v1236_v47, %v1236_v47  ;;  %1673 = vst.sshfl [vmem:[%s3086_s4 + $0xd] sm:$0x1 pattern:$0x73625140] %v1228_v43 }
 0x58a   :  { %1674 = vst.sshfl [vmem:[%s3086_s4 + $0x25] sm:$0x1 pattern:$0x73625140] %v1227_v45 }
 0x58b   :  { %v1257_v46 = vrot.slane %v1229_v3, %v2684_v49  ;;  %v1259_v48 = vcombine.high %v1243_v51, %v1243_v51  ;;  %v1260_v50 = vcombine.high %v1250_v13, %v1250_v13  ;;  %1272 = vst [vmem:[%s3086_s4 + $0x15] sm:$0x1] %v1258_v18  ;;  %1675 = vst.sshfl [vmem:[%s3086_s4 + $0x2d] sm:$0x1 pattern:$0x73625140] %v1229_v3 }
 0x58d   :  { %v1261_v52 = vcombine.high %v1257_v46, %v1257_v46  ;;  %1273 = vst [vmem:[%s3086_s4 + $0x1d] sm:$0x1] %v1260_v50  ;;  %1276 = vst [vmem:[%s3086_s4 + $0x35] sm:$0x1] %v1259_v48 }
 0x58f   :  { %1277 = vst [vmem:[%s3086_s4 + $0x3d] sm:$0x1] %v1261_v52 }
 0x658   :  { %v1391_v55 = vpop.f32.mrb[6].mxu1 }
 0x659   :  { %v1392_v56 = vadd.f32 %v1391_v55, %v2714_v36  ;;  %v2132_v57 = vpop.f32.mrb[7].mxu1 }
 0x65b   :  { %2408 = vtanh.f32 %v1392_v56 }
 0x665   :  { %v2409_v59 = vpop.eup %2408 }
 0x666   :  { %v1397_v60 = vcombine.high %v2409_v59, %v2409_v59  ;;  %v1404_v62 = vrot.slane %v2409_v59, %v2684_v49  ;;  %2166 = vmatmul.mubr.f32.vlgmr.msra.gmra.mrb[14].mxu0 %v2409_v59 }
 0x668   :  { %v1411_v63 = vrot.slane %v1397_v60, %v2684_v49  ;;  %v1412_v1 = vcombine.high %v1404_v62, %v1404_v62  ;;  %v1420_v2 = vrot.slane %v1404_v62, %v2684_v49  ;;  %1676 = vst.sshfl [vmem:[%s3086_s4 + $0x6] sm:$0x1 pattern:$0x73625140] %v1404_v62 }
 0x66a   :  { %v1413_v6 = vcombine.high %v1411_v63, %v1411_v63  ;;  %v1427_v7 = vrot.slane %v1411_v63, %v2684_v49  ;;  %v1434_v36 = vrot.slane %v1412_v1, %v2684_v49  ;;  %v1442_v8 = vcombine.high %v1420_v2, %v1420_v2  ;;  %1677 = vst.sshfl [vmem:[%s3086_s4 + $0xe] sm:$0x1 pattern:$0x73625140] %v1412_v1 }
 0x66b   :  { %1678 = vst.sshfl [vmem:[%s3086_s4 + $0x26] sm:$0x1 pattern:$0x73625140] %v1411_v63 }
 0x66c   :  { %v1441_v9 = vrot.slane %v1413_v6, %v2684_v49  ;;  %v1443_v10 = vcombine.high %v1427_v7, %v1427_v7  ;;  %v1444_v11 = vcombine.high %v1434_v36, %v1434_v36  ;;  %1456 = vst [vmem:[%s3086_s4 + $0x16] sm:$0x1] %v1442_v8  ;;  %1679 = vst.sshfl [vmem:[%s3086_s4 + $0x2e] sm:$0x1 pattern:$0x73625140] %v1413_v6 }
 0x66e   :  { %v1445_v0 = vcombine.high %v1441_v9, %v1441_v9  ;;  %1457 = vst [vmem:[%s3086_s4 + $0x1e] sm:$0x1] %v1444_v11  ;;  %1460 = vst [vmem:[%s3086_s4 + $0x36] sm:$0x1] %v1443_v10 }
 0x670   :  { %1461 = vst [vmem:[%s3086_s4 + $0x3e] sm:$0x1] %v1445_v0 }
 0x739   :  { %v1575_v12 = vpop.f32.mrb[14].mxu0 }
 0x73a   :  { %v1576_v14 = vadd.f32 %v1575_v12, %v2751_v5  ;;  %v2167_v54 = vpop.f32.mrb[15].mxu0 }
 0x73c   :  { %2410 = vtanh.f32 %v1576_v14 }
 0x746   :  { %v2411_v16 = vpop.eup %2410 }
 0x747   :  { %v1581_v20 = vcombine.high %v2411_v16, %v2411_v16  ;;  %v1588_v21 = vrot.slane %v2411_v16, %v2684_v49 }
 0x749   :  { %v1595_v22 = vrot.slane %v1581_v20, %v2684_v49  ;;  %v1596_v23 = vcombine.high %v1588_v21, %v1588_v21  ;;  %v1604_v24 = vrot.slane %v1588_v21, %v2684_v49  ;;  %1680 = vst.sshfl [vmem:[%s3086_s4 + $0x7] sm:$0x1 pattern:$0x73625140] %v1588_v21 }
 0x74b   :  { %v1597_v26 = vcombine.high %v1595_v22, %v1595_v22  ;;  %v1611_v27 = vrot.slane %v1595_v22, %v2684_v49  ;;  %v1618_v5 = vrot.slane %v1596_v23, %v2684_v49  ;;  %v1626_v58 = vcombine.high %v1604_v24, %v1604_v24  ;;  %1681 = vst.sshfl [vmem:[%s3086_s4 + $0xf] sm:$0x1 pattern:$0x73625140] %v1596_v23 }
 0x74c   :  { %1682 = vst.sshfl [vmem:[%s3086_s4 + $0x27] sm:$0x1 pattern:$0x73625140] %v1595_v22 }
 0x74d   :  { %v1625_v28 = vrot.slane %v1597_v26, %v2684_v49  ;;  %v1627_v53 = vcombine.high %v1611_v27, %v1611_v27  ;;  %v1628_v29 = vcombine.high %v1618_v5, %v1618_v5  ;;  %1640 = vst [vmem:[%s3086_s4 + $0x17] sm:$0x1] %v1626_v58  ;;  %1683 = vst.sshfl [vmem:[%s3086_s4 + $0x2f] sm:$0x1 pattern:$0x73625140] %v1597_v26 }
 0x74f   :  { %v1629_v4 = vcombine.high %v1625_v28, %v1625_v28  ;;  %1641 = vst [vmem:[%s3086_s4 + $0x1f] sm:$0x1] %v1628_v29  ;;  %1644 = vst [vmem:[%s3086_s4 + $0x37] sm:$0x1] %v1627_v53 }
 0x751   :  { %1645 = vst [vmem:[%s3086_s4 + $0x3f] sm:$0x1] %v1629_v4 }

// kernel: _forward.1
= control target key start
LH: loop header
LB: loop body
LE: loop exit
PB: predicated region body
PF: predicated region fallthrough
CT: control target
= control target key end

     0   :  { %v2412_v3 = vmov 0.0|0.0   ;;  %vm2413_vm0 = vmmov 0   ;;  %v2414_v4 = vmov 0.0   ;;  %vm200_vm1 = vcmask 1041409   ;;  %s3082_s2 = inlined_call_operand.vmem [shape: f32[128,128], index: 2, kind: input, shape index: {}]   ;;  %s3083_s1 = inlined_call_operand.vmem [shape: f32[128,128], index: 1, kind: input, shape index: {}]   ;;  %s3084_s0 = inlined_call_operand.vmem [shape: f32[8,8,128], index: 0, kind: input, shape index: {}]   ;;  %s3085_s3 = inlined_call_operand.vmem [shape: f32[1,128], index: 3, kind: input, shape index: {}]   ;;  %s3086_s4 = inlined_call_operand.vmem [shape: f32[8,8,128], index: 4, kind: output, shape index: {}]  }
   0x1   :  { %v30_v0 = vld [vmem:[%s3082_s2] sm:$0xff]  ;;  %v31_v1 = vld [vmem:[%s3082_s2 + $0x8] sm:$0xff]  ;;  %v32_v2 = vld [vmem:[%s3082_s2 + $0x10] sm:$0xff]  ;;  %2200 = vmatprep.subr.bf16.mxu1 %v2412_v3  ;;  %1920 = vmatprep.mubr.msk.f32.mxu1 %vm2413_vm0, %v2414_v4  ;;  %vm203_vm2 = vcmask 1042434   ;;  %vm206_vm3 = vcmask 1043459   ;;  %vm209_vm4 = vcmask 1044484  }
   0x2   :  { %v2168_v5 = vpack.c.bf16 %v31_v1, %v30_v0  ;;  %v33_v6 = vld [vmem:[%s3082_s2 + $0x18] sm:$0xff]  ;;  %v34_v8 = vld [vmem:[%s3082_s2 + $0x20] sm:$0xff]  ;;  %v35_v9 = vld [vmem:[%s3082_s2 + $0x28] sm:$0xff]  ;;  %vm212_vm5 = vcmask 1045509   ;;  %vm215_vm6 = vcmask 1046534   ;;  %vm218_vm7 = vcmask 1047559  }
   0x3   :  { %v2172_v7 = vpack.c.bf16 %v33_v6, %v32_v2  ;;  %v167_v10 = vld [vmem:[%s3083_s1] sm:$0xff]  ;;  %v2176_v11 = vpack.c.bf16 %v35_v9, %v34_v8  ;;  %v36_v12 = vld [vmem:[%s3082_s2 + $0x30] sm:$0xff]  ;;  %v37_v13 = vld [vmem:[%s3082_s2 + $0x38] sm:$0xff] }
   0x4   :  { %2169 = vmatprep.subr.bf16.mxu0 %v2168_v5  ;;  %v168_v14 = vld [vmem:[%s3083_s1 + $0x8] sm:$0xff]  ;;  %v22_v16 = vld [vmem:[%s3084_s0] sm:$0xff]  ;;  %v169_v17 = vld [vmem:[%s3083_s1 + $0x10] sm:$0xff]  ;;  %v2180_v20 = vpack.c.bf16 %v37_v13, %v36_v12 }
   0x5   :  { %2171 = vmatpush3.bf16.msra.mxu0 %v2168_v5  ;;  %v2474_v15 = vpack.c.bf16 %v168_v14, %v167_v10  ;;  %v170_v18 = vld [vmem:[%s3083_s1 + $0x18] sm:$0xff]  ;;  %1876 = vmatprep.mubr.f32.mxu0 %v22_v16  ;;  %v171_v21 = vld [vmem:[%s3083_s1 + $0x20] sm:$0xff]  ;;  %v172_v22 = vld [vmem:[%s3083_s1 + $0x28] sm:$0xff] }
   0x6   :  { %2173 = vmatprep.subr.bf16.mxu0 %v2172_v7  ;;  %v2486_v19 = vpack.c.bf16 %v170_v18, %v169_v17  ;;  %v38_v23 = vld [vmem:[%s3082_s2 + $0x40] sm:$0xff]  ;;  %v39_v24 = vld [vmem:[%s3082_s2 + $0x48] sm:$0xff]  ;;  %v2502_v25 = vpack.c.bf16 %v172_v22, %v171_v21  ;;  %v173_v27 = vld [vmem:[%s3083_s1 + $0x30] sm:$0xff] }
   0x7   :  { %2202 = vmatpush3.bf16.msra.mxu1 %v2474_v15  ;;  %v2184_v26 = vpack.c.bf16 %v39_v24, %v38_v23  ;;  %v174_v28 = vld [vmem:[%s3083_s1 + $0x38] sm:$0xff]  ;;  %v40_v29 = vld [vmem:[%s3082_s2 + $0x50] sm:$0xff]  ;;  %v175_v33 = vld [vmem:[%s3083_s1 + $0x40] sm:$0xff] }
   0x8   :  { %2203 = vmatprep.subr.bf16.mxu1 %v2412_v3  ;;  %v41_v30 = vld [vmem:[%s3082_s2 + $0x58] sm:$0xff]  ;;  %v2518_v31 = vpack.c.bf16 %v174_v28, %v173_v27  ;;  %v176_v34 = vld [vmem:[%s3083_s1 + $0x48] sm:$0xff]  ;;  %v42_v35 = vld [vmem:[%s3082_s2 + $0x60] sm:$0xff] }
   0x9   :  { %2175 = vmatpush3.bf16.msra.mxu0 %v2172_v7  ;;  %v2188_v32 = vpack.c.bf16 %v41_v30, %v40_v29  ;;  %v43_v36 = vld [vmem:[%s3082_s2 + $0x68] sm:$0xff]  ;;  %v2534_v37 = vpack.c.bf16 %v176_v34, %v175_v33  ;;  %v177_v39 = vld [vmem:[%s3083_s1 + $0x50] sm:$0xff]  ;;  %v178_v40 = vld [vmem:[%s3083_s1 + $0x58] sm:$0xff] }
   0xa   :  { %2177 = vmatprep.subr.bf16.mxu0 %v2176_v11  ;;  %v2192_v38 = vpack.c.bf16 %v43_v36, %v42_v35  ;;  %v44_v41 = vld [vmem:[%s3082_s2 + $0x70] sm:$0xff]  ;;  %v45_v42 = vld [vmem:[%s3082_s2 + $0x78] sm:$0xff]  ;;  %v2550_v43 = vpack.c.bf16 %v178_v40, %v177_v39  ;;  %v179_v45 = vld [vmem:[%s3083_s1 + $0x60] sm:$0xff] }
   0xb   :  { %2205 = vmatpush3.bf16.msra.mxu1 %v2486_v19  ;;  %v2196_v44 = vpack.c.bf16 %v45_v42, %v44_v41  ;;  %v180_v46 = vld [vmem:[%s3083_s1 + $0x68] sm:$0xff]  ;;  %v181_v48 = vld [vmem:[%s3083_s1 + $0x70] sm:$0xff]  ;;  %v182_v49 = vld [vmem:[%s3083_s1 + $0x78] sm:$0xff] }
   0xc   :  { %2206 = vmatprep.subr.bf16.mxu1 %v2412_v3  ;;  %v2560_v47 = vpack.c.bf16 %v180_v46, %v179_v45  ;;  %v23_v50 = vld [vmem:[%s3084_s0 + $0x8] sm:$0xff]  ;;  %v2573_v51 = vpack.c.bf16 %v182_v49, %v181_v48  ;;  %v24_v52 = vld [vmem:[%s3084_s0 + $0x10] sm:$0xff]  ;;  %v25_v53 = vld [vmem:[%s3084_s0 + $0x18] sm:$0xff] }
   0xd   :  { %2179 = vmatpush3.bf16.msra.mxu0 %v2176_v11  ;;  %v26_v54 = vld [vmem:[%s3084_s0 + $0x20] sm:$0xff]  ;;  %v27_v55 = vld [vmem:[%s3084_s0 + $0x28] sm:$0xff]  ;;  %v28_v56 = vld [vmem:[%s3084_s0 + $0x30] sm:$0xff] }
   0xe   :  { %2181 = vmatprep.subr.bf16.mxu0 %v2180_v20  ;;  %v29_v57 = vld [vmem:[%s3084_s0 + $0x38] sm:$0xff]  ;;  %v1651_v58 = vld [vmem:[%s3085_s3] ss:$0 sm:$0xff] }
   0xf   :  { %2208 = vmatpush3.bf16.msra.mxu1 %v2502_v25 }
  0x10   :  { %2209 = vmatprep.subr.bf16.mxu1 %v2412_v3 }
  0x11   :  { %2183 = vmatpush3.bf16.msra.mxu0 %v2180_v20 }
  0x12   :  { %2185 = vmatprep.subr.bf16.mxu0 %v2184_v26 }
  0x13   :  { %2211 = vmatpush3.bf16.msra.mxu1 %v2518_v31 }
  0x14   :  { %2212 = vmatprep.subr.bf16.mxu1 %v2412_v3 }
  0x15   :  { %2187 = vmatpush3.bf16.msra.mxu0 %v2184_v26 }
  0x16   :  { %2189 = vmatprep.subr.bf16.mxu0 %v2188_v32 }
  0x17   :  { %2214 = vmatpush3.bf16.msra.mxu1 %v2534_v37 }
  0x18   :  { %2215 = vmatprep.subr.bf16.mxu1 %v2412_v3 }
  0x19   :  { %2191 = vmatpush3.bf16.msra.mxu0 %v2188_v32 }
  0x1a   :  { %2193 = vmatprep.subr.bf16.mxu0 %v2192_v38 }
  0x1b   :  { %2217 = vmatpush3.bf16.msra.mxu1 %v2550_v43 }
  0x1c   :  { %2218 = vmatprep.subr.bf16.mxu1 %v2412_v3 }
  0x1d   :  { %2195 = vmatpush3.bf16.msra.mxu0 %v2192_v38 }
  0x1e   :  { %2197 = vmatprep.subr.bf16.mxu0 %v2196_v44 }
  0x1f   :  { %2220 = vmatpush3.bf16.msra.mxu1 %v2560_v47 }
  0x20   :  { %2221 = vmatprep.subr.bf16.mxu1 %v2412_v3 }
  0x21   :  { %2199 = vmatpush3.bf16.msra.mxu0 %v2196_v44 }
  0x22   :  { %2224 = vmatprep.subr.bf16.mxu0 %v2412_v3 }
  0x23   :  { %2223 = vmatpush3.bf16.msra.mxu1 %v2573_v51 }
  0x24   :  { %1877 = vmatmul.mubr.f32.vlgmr.msra.gmra.mrb[0].mxu0 %v23_v50  ;;  %2248 = vmatprep.subr.bf16.mxu1 %v2412_v3 }
  0x25   :  { %1879 = vmatprep.mubr.f32.mxu0 %v24_v52  ;;  %2226 = vmatpush3.bf16.msra.mxu0 %v2474_v15  ;;  %v2415_v52 = vmov 1966171168  }
  0x26   :  { %2227 = vmatprep.subr.bf16.mxu0 %v2412_v3  ;;  %1921 = vmatmul.mubr.f32.vlgmr.msra.gmra.mrb[0].mxu1 %v2414_v4 }
  0x27   :  { %2250 = vmatpush3.bf16.msra.mxu1 %v2474_v15  ;;  %1990 = vmatprep.mubr.msk.f32.mxu1 %vm2413_vm0, %v2414_v4 }
  0x28   :  { %1880 = vmatmul.mubr.f32.gmra.mrb[2].mxu0 %v25_v53  ;;  %2251 = vmatprep.subr.bf16.mxu1 %v2412_v3  ;;  %v2642_v53 = vunpack.c.l.s4 %v2415_v52 }
  0x29   :  { %1882 = vmatprep.mubr.f32.mxu0 %v26_v54  ;;  %2229 = vmatpush3.bf16.msra.mxu0 %v2486_v19 }
  0x2a   :  { %2230 = vmatprep.subr.bf16.mxu0 %v2412_v3 }
  0x2b   :  { %2253 = vmatpush3.bf16.msra.mxu1 %v2486_v19 }
  0x2c   :  { %1883 = vmatmul.mubr.f32.gmra.mrb[4].mxu0 %v27_v55  ;;  %2254 = vmatprep.subr.bf16.mxu1 %v2412_v3 }
  0x2d   :  { %1885 = vmatprep.mubr.f32.mxu0 %v28_v56  ;;  %2232 = vmatpush3.bf16.msra.mxu0 %v2502_v25 }
  0x2e   :  { %2233 = vmatprep.subr.bf16.mxu0 %v2412_v3 }
  0x2f   :  { %2256 = vmatpush3.bf16.msra.mxu1 %v2502_v25 }
  0x30   :  { %1886 = vmatmul.mubr.f32.gmra.mrb[6].mxu0 %v29_v57  ;;  %2257 = vmatprep.subr.bf16.mxu1 %v2412_v3 }
  0x31   :  { %1955 = vmatprep.mubr.msk.f32.mxu0 %vm2413_vm0, %v2414_v4  ;;  %2235 = vmatpush3.bf16.msra.mxu0 %v2518_v31 }
  0x32   :  { %2236 = vmatprep.subr.bf16.mxu0 %v2412_v3 }
  0x33   :  { %2259 = vmatpush3.bf16.msra.mxu1 %v2518_v31 }
  0x34   :  { %2260 = vmatprep.subr.bf16.mxu1 %v2412_v3 }
  0x35   :  { %2238 = vmatpush3.bf16.msra.mxu0 %v2534_v37 }
  0x36   :  { %2239 = vmatprep.subr.bf16.mxu0 %v2412_v3 }
  0x37   :  { %2262 = vmatpush3.bf16.msra.mxu1 %v2534_v37 }
  0x38   :  { %2263 = vmatprep.subr.bf16.mxu1 %v2412_v3 }
  0x39   :  { %2241 = vmatpush3.bf16.msra.mxu0 %v2550_v43 }
  0x3a   :  { %2242 = vmatprep.subr.bf16.mxu0 %v2412_v3 }
  0x3b   :  { %2265 = vmatpush3.bf16.msra.mxu1 %v2550_v43 }
  0x3c   :  { %2266 = vmatprep.subr.bf16.mxu1 %v2412_v3 }
  0x3d   :  { %2244 = vmatpush3.bf16.msra.mxu0 %v2560_v47 }
  0x3e   :  { %2245 = vmatprep.subr.bf16.mxu0 %v2412_v3 }
  0x3f   :  { %2268 = vmatpush3.bf16.msra.mxu1 %v2560_v47 }
  0x40   :  { %2269 = vmatprep.subr.bf16.mxu1 %v2412_v3 }
  0x41   :  { %2247 = vmatpush3.bf16.msra.mxu0 %v2573_v51 }
  0x42   :  { %2272 = vmatprep.subr.bf16.mxu0 %v2412_v3 }
  0x43   :  { %2271 = vmatpush3.bf16.msra.mxu1 %v2573_v51 }
  0x44   :  { %2296 = vmatprep.subr.bf16.mxu1 %v2412_v3 }
  0xf7   :  { %v1878_v59 = vpop.f32.mrb[0].mxu0 }
  0xf8   :  { %v125_v60 = vadd.f32 %v1878_v59, %v1651_v58  ;;  %v119_v61 = vpop.f32.mrb[1].mxu0 }
  0xf9   :  { %v120_v62 = vadd.f32 %v1651_v58, %v119_v61  ;;  %v2637_v0 = vpop.f32.mrb[0].mxu1 }
  0xfa   :  { %159 = vst [vmem:[#allocation3 + $0x8] sm:$0xff] %v125_v60  ;;  %v1922_v5 = vpop.f32.mrb[1].mxu1 }
  0xfb   :  { %158 = vst [vmem:[#allocation3] sm:$0xff] %v120_v62  ;;  %v1881_v63 = vpop.f32.mrb[2].mxu0 }
  0xfc   :  { %v135_v1 = vadd.f32 %v1881_v63, %v1651_v58  ;;  %v129_v2 = vpop.f32.mrb[3].mxu0 }
  0xfd   :  { %v130_v6 = vadd.f32 %v1651_v58, %v129_v2 }
  0xfe   :  { %161 = vst [vmem:[#allocation3 + $0x18] sm:$0xff] %v135_v1 }
  0xff   :  { %160 = vst [vmem:[#allocation3 + $0x10] sm:$0xff] %v130_v6  ;;  %v1884_v7 = vpop.f32.mrb[4].mxu0 }
 0x100   :  { %v145_v8 = vadd.f32 %v1884_v7, %v1651_v58  ;;  %v139_v9 = vpop.f32.mrb[5].mxu0 }
 0x101   :  { %v140_v10 = vadd.f32 %v1651_v58, %v139_v9  ;;  %v184_v11 = vld [vmem:[#allocation3 + $0x8] sm:$0x1]  ;;  %v375_v12 = vld [vmem:[#allocation3 + $0x9] sm:$0x1]  ;;  %v559_v18 = vld [vmem:[#allocation3 + $0xa] sm:$0x1] }
 0x102   :  { %163 = vst [vmem:[#allocation3 + $0x28] sm:$0xff] %v145_v8  ;;  %v199_v13 = vrot.slane %v184_v11, 7  ;;  %v183_v16 = vld [vmem:[#allocation3] sm:$0x1]  ;;  %v390_v17 = vrot.slane %v375_v12, 7  ;;  %v574_v34 = vrot.slane %v559_v18, 7 }
 0x103   :  { %162 = vst [vmem:[#allocation3 + $0x20] sm:$0xff] %v140_v10  ;;  %v1887_v14 = vpop.f32.mrb[6].mxu0  ;;  %v374_v22 = vld [vmem:[#allocation3 + $0x1] sm:$0x1]  ;;  %v743_v23 = vld [vmem:[#allocation3 + $0xb] sm:$0x1] }
 0x104   :  { %v155_v20 = vadd.f32 %v1887_v14, %v1651_v58  ;;  %v149_v21 = vpop.f32.mrb[7].mxu0  ;;  %v558_v28 = vld [vmem:[#allocation3 + $0x2] sm:$0x1]  ;;  %v201_v32 = vsel %vm200_vm1, %v199_v13, %v183_v16  ;;  %v391_v38 = vsel %vm200_vm1, %v390_v17, %v374_v22  ;;  %v742_v45 = vld [vmem:[#allocation3 + $0x3] sm:$0x1]  ;;  %v758_v48 = vrot.slane %v743_v23, 7 }
 0x105   :  { %v150_v24 = vadd.f32 %v1651_v58, %v149_v21  ;;  %v186_v26 = vld [vmem:[#allocation3 + $0x18] sm:$0x1]  ;;  %v377_v27 = vld [vmem:[#allocation3 + $0x19] sm:$0x1]  ;;  %v561_v29 = vld [vmem:[#allocation3 + $0x1a] sm:$0x1]  ;;  %v575_v62 = vsel %vm200_vm1, %v574_v34, %v558_v28  ;;  %v297_v17 = vlaneseq }
 0x106   :  { %165 = vst [vmem:[#allocation3 + $0x38] sm:$0xff] %v155_v20  ;;  %v185_v30 = vld [vmem:[#allocation3 + $0x10] sm:$0x1]  ;;  %v376_v33 = vld [vmem:[#allocation3 + $0x11] sm:$0x1]  ;;  %v205_v36 = vrot.slane %v186_v26, 5  ;;  %v759_v22 = vsel %vm200_vm1, %v758_v48, %v742_v45 }
 0x107   :  { %164 = vst [vmem:[#allocation3 + $0x30] sm:$0xff] %v150_v24  ;;  %v202_v35 = vrot.slane %v185_v30, 6  ;;  %v392_v39 = vrot.slane %v376_v33, 6  ;;  %v560_v40 = vld [vmem:[#allocation3 + $0x12] sm:$0x1]  ;;  %v394_v41 = vrot.slane %v377_v27, 5 }
 0x108   :  { %v576_v42 = vrot.slane %v560_v40, 6  ;;  %v578_v44 = vrot.slane %v561_v29, 5  ;;  %v744_v46 = vld [vmem:[#allocation3 + $0x13] sm:$0x1]  ;;  %v745_v7 = vld [vmem:[#allocation3 + $0x1b] sm:$0x1] }
 0x109   :  { %v188_v49 = vld [vmem:[#allocation3 + $0x28] sm:$0x1]  ;;  %v204_v50 = vsel %vm203_vm2, %v202_v35, %v201_v32  ;;  %v379_v54 = vld [vmem:[#allocation3 + $0x29] sm:$0x1]  ;;  %v393_v55 = vsel %vm203_vm2, %v392_v39, %v391_v38  ;;  %v563_v56 = vld [vmem:[#allocation3 + $0x2a] sm:$0x1] }
 0x10a   :  { %v187_v57 = vld [vmem:[#allocation3 + $0x20] sm:$0x1]  ;;  %v211_v58 = vrot.slane %v188_v49, 3  ;;  %v378_v59 = vld [vmem:[#allocation3 + $0x21] sm:$0x1]  ;;  %v395_v60 = vsel %vm206_vm3, %v394_v41, %v393_v55  ;;  %v398_v61 = vrot.slane %v379_v54, 3  ;;  %v577_v5 = vsel %vm203_vm2, %v576_v42, %v575_v62 }
 0x10b   :  { %v208_v63 = vrot.slane %v187_v57, 4  ;;  %v396_v1 = vrot.slane %v378_v59, 4  ;;  %v562_v2 = vld [vmem:[#allocation3 + $0x22] sm:$0x1]  ;;  %v582_v6 = vrot.slane %v563_v56, 3  ;;  %v207_v8 = vsel %vm206_vm3, %v205_v36, %v204_v50 }
 0x10c   :  { %v579_v9 = vsel %vm206_vm3, %v578_v44, %v577_v5  ;;  %v580_v10 = vrot.slane %v562_v2, 4  ;;  %v746_v11 = vld [vmem:[#allocation3 + $0x23] sm:$0x1]  ;;  %v747_v12 = vld [vmem:[#allocation3 + $0x2b] sm:$0x1]  ;;  %v760_v13 = vrot.slane %v744_v46, 6 }
 0x10d   :  { %v190_v14 = vld [vmem:[#allocation3 + $0x38] sm:$0x1]  ;;  %v210_v16 = vsel %vm209_vm4, %v208_v63, %v207_v8  ;;  %v381_v18 = vld [vmem:[#allocation3 + $0x39] sm:$0x1]  ;;  %v397_v20 = vsel %vm209_vm4, %v396_v1, %v395_v60  ;;  %v565_v21 = vld [vmem:[#allocation3 + $0x3a] sm:$0x1] }
 0x10e   :  { %v189_v23 = vld [vmem:[#allocation3 + $0x30] sm:$0x1]  ;;  %v213_v24 = vsel %vm212_vm5, %v211_v58, %v210_v16  ;;  %v217_v26 = vrot.slane %v190_v14, 1  ;;  %v380_v27 = vld [vmem:[#allocation3 + $0x31] sm:$0x1]  ;;  %v399_v28 = vsel %vm212_vm5, %v398_v61, %v397_v20  ;;  %v402_v29 = vrot.slane %v381_v18, 1 }
 0x10f   :  { %v214_v30 = vrot.slane %v189_v23, 2  ;;  %v400_v32 = vrot.slane %v380_v27, 2  ;;  %v564_v33 = vld [vmem:[#allocation3 + $0x32] sm:$0x1]  ;;  %v581_v34 = vsel %vm209_vm4, %v580_v10, %v579_v9  ;;  %v586_v35 = vrot.slane %v565_v21, 1 }
 0x110   :  { %v583_v36 = vsel %vm212_vm5, %v582_v6, %v581_v34  ;;  %v584_v38 = vrot.slane %v564_v33, 2  ;;  %v748_v39 = vld [vmem:[#allocation3 + $0x33] sm:$0x1]  ;;  %v749_v40 = vld [vmem:[#allocation3 + $0x3b] sm:$0x1]  ;;  %v761_v41 = vsel %vm203_vm2, %v760_v13, %v759_v22  ;;  %v762_v42 = vrot.slane %v745_v7, 5 }
 0x111   :  { %v216_v44 = vsel %vm215_vm6, %v214_v30, %v213_v24  ;;  %v401_v45 = vsel %vm215_vm6, %v400_v32, %v399_v28  ;;  %v764_v46 = vrot.slane %v746_v11, 4  ;;  %v766_v48 = vrot.slane %v747_v12, 3  ;;  %v927_v49 = vld [vmem:[#allocation3 + $0xc] sm:$0x1]  ;;  %v928_v50 = vld [vmem:[#allocation3 + $0x14] sm:$0x1] }
 0x112   :  { %v219_v52 = vsel %vm218_vm7, %v217_v26, %v216_v44  ;;  %v2662_v54 = vsel %vm218_vm7, %v402_v29, %v401_v45  ;;  %v585_v55 = vsel %vm215_vm6, %v584_v38, %v583_v36  ;;  %v763_v56 = vsel %vm206_vm3, %v762_v42, %v761_v41  ;;  %v926_v57 = vld [vmem:[#allocation3 + $0x4] sm:$0x1]  ;;  %v929_v58 = vld [vmem:[#allocation3 + $0x1c] sm:$0x1]  ;;  %v931_v1 = vld [vmem:[#allocation3 + $0x2c] sm:$0x1] }
 0x113   :  { %v930_v59 = vld [vmem:[#allocation3 + $0x24] sm:$0x1]  ;;  %v288_v60 = vadd.f32 %v2637_v0, %v219_v52  ;;  %v2668_v61 = vsel %vm218_vm7, %v586_v35, %v585_v55  ;;  %v765_v62 = vsel %vm209_vm4, %v764_v46, %v763_v56  ;;  %v768_v63 = vrot.slane %v748_v39, 2  ;;  %v932_v2 = vld [vmem:[#allocation3 + $0x34] sm:$0x1] }
 0x114   :  { %v767_v5 = vsel %vm212_vm5, %v766_v48, %v765_v62  ;;  %v770_v6 = vrot.slane %v749_v40, 1  ;;  %v933_v7 = vld [vmem:[#allocation3 + $0x3c] sm:$0x1]  ;;  %v942_v8 = vrot.slane %v927_v49, 7  ;;  %v944_v9 = vrot.slane %v928_v50, 6 }
 0x115   :  { %v1110_v10 = vld [vmem:[#allocation3 + $0x5] sm:$0x1]  ;;  %2396 = vtanh.f32 %v288_v60  ;;  %v296_v11 = vunpack.c.0.s8 %v2642_v53  ;;  %v769_v0 = vsel %vm215_vm6, %v768_v63, %v767_v5  ;;  %v948_v12 = vrot.slane %v930_v59, 4  ;;  %v1111_v13 = vld [vmem:[#allocation3 + $0xd] sm:$0x1] }
 0x116   :  { %v1112_v14 = vld [vmem:[#allocation3 + $0x15] sm:$0x1]  ;;  %v298_v16 = vshrl.u32 %v297_v17, 7  ;;  %v2675_v18 = vsel %vm218_vm7, %v770_v6, %v769_v0  ;;  %v943_v20 = vsel %vm200_vm1, %v942_v8, %v926_v57  ;;  %v946_v21 = vrot.slane %v929_v58, 5  ;;  %v1113_v22 = vld [vmem:[#allocation3 + $0x1d] sm:$0x1] }
 0x117   :  { %v1114_v23 = vld [vmem:[#allocation3 + $0x25] sm:$0x1]  ;;  %v945_v24 = vsel %vm203_vm2, %v944_v9, %v943_v20  ;;  %v950_v26 = vrot.slane %v931_v1, 3  ;;  %v952_v27 = vrot.slane %v932_v2, 2  ;;  %v1116_v28 = vld [vmem:[#allocation3 + $0x35] sm:$0x1] }
 0x118   :  { %v1126_v53 = vrot.slane %v1111_v13, 7  ;;  %v947_v29 = vsel %vm206_vm3, %v946_v21, %v945_v24  ;;  %v1115_v30 = vld [vmem:[#allocation3 + $0x2d] sm:$0x1]  ;;  %v1117_v32 = vld [vmem:[#allocation3 + $0x3d] sm:$0x1]  ;;  %v1128_v33 = vrot.slane %v1112_v14, 6  ;;  %v2684_v49 = vsub.s32 %v296_v11, %v298_v16 }
 0x119   :  { %v1132_v17 = vrot.slane %v1114_v23, 4  ;;  %v949_v34 = vsel %vm209_vm4, %v948_v12, %v947_v29  ;;  %v954_v35 = vrot.slane %v933_v7, 1  ;;  %v1130_v38 = vrot.slane %v1113_v22, 5  ;;  %v1294_v39 = vld [vmem:[#allocation3 + $0x6] sm:$0x1] }
 0x11a   :  { %v1127_v36 = vsel %vm200_vm1, %v1126_v53, %v1110_v10  ;;  %v1295_v40 = vld [vmem:[#allocation3 + $0xe] sm:$0x1]  ;;  %v951_v41 = vsel %vm212_vm5, %v950_v26, %v949_v34  ;;  %v1136_v44 = vrot.slane %v1116_v28, 2  ;;  %v1296_v45 = vld [vmem:[#allocation3 + $0x16] sm:$0x1]  ;;  %v1134_v55 = vrot.slane %v1115_v30, 3 }
 0x11b   :  { %v1129_v42 = vsel %vm203_vm2, %v1128_v33, %v1127_v36  ;;  %v1297_v46 = vld [vmem:[#allocation3 + $0x1e] sm:$0x1]  ;;  %v1310_v48 = vrot.slane %v1295_v40, 7  ;;  %v953_v50 = vsel %vm215_vm6, %v952_v27, %v951_v41  ;;  %v1298_v56 = vld [vmem:[#allocation3 + $0x26] sm:$0x1]  ;;  %v1138_v60 = vrot.slane %v1117_v32, 1 }
 0x11c   :  { %v1131_v52 = vsel %vm206_vm3, %v1130_v38, %v1129_v42  ;;  %v1300_v57 = vld [vmem:[#allocation3 + $0x36] sm:$0x1]  ;;  %v2689_v58 = vsel %vm218_vm7, %v954_v35, %v953_v50  ;;  %v1299_v62 = vld [vmem:[#allocation3 + $0x2e] sm:$0x1]  ;;  %v1312_v63 = vrot.slane %v1296_v45, 6  ;;  %v1314_v5 = vrot.slane %v1297_v46, 5 }
 0x11d   :  { %v1133_v59 = vsel %vm209_vm4, %v1132_v17, %v1131_v52  ;;  %v1311_v2 = vsel %vm200_vm1, %v1310_v48, %v1294_v39  ;;  %v1316_v6 = vrot.slane %v1298_v56, 4  ;;  %v1479_v7 = vld [vmem:[#allocation3 + $0xf] sm:$0x1]  ;;  %v1301_v9 = vld [vmem:[#allocation3 + $0x3e] sm:$0x1]  ;;  %v1320_v11 = vrot.slane %v1300_v57, 2 }
 0x11e   :  { %v1135_v1 = vsel %vm212_vm5, %v1134_v55, %v1133_v59  ;;  %v1313_v10 = vsel %vm203_vm2, %v1312_v63, %v1311_v2  ;;  %v1480_v0 = vld [vmem:[#allocation3 + $0x17] sm:$0x1]  ;;  %v1318_v16 = vrot.slane %v1299_v62, 3  ;;  %v1478_v20 = vld [vmem:[#allocation3 + $0x7] sm:$0x1]  ;;  %v1494_v27 = vrot.slane %v1479_v7, 7 }
 0x11f   :  { %v1137_v8 = vsel %vm215_vm6, %v1136_v44, %v1135_v1  ;;  %v2397_v12 = vpop.eup %2396  ;;  %v1315_v14 = vsel %vm206_vm3, %v1314_v5, %v1313_v10  ;;  %v1481_v24 = vld [vmem:[#allocation3 + $0x1f] sm:$0x1]  ;;  %v1482_v26 = vld [vmem:[#allocation3 + $0x27] sm:$0x1]  ;;  %v1322_v53 = vrot.slane %v1301_v9, 1  ;;  %v1496_v29 = vrot.slane %v1480_v0, 6 }
 0x120   :  { %v2697_v13 = vsel %vm218_vm7, %v1138_v60, %v1137_v8  ;;  %v293_v21 = vcombine.high %v2397_v12, %v2397_v12  ;;  %v300_v22 = vrot.slane %v2397_v12, %v2684_v49  ;;  %1956 = vmatmul.mubr.f32.vlgmr.msra.gmra.mrb[8].mxu0 %v2397_v12  ;;  %v1317_v23 = vsel %vm209_vm4, %v1316_v6, %v1315_v14  ;;  %v1483_v34 = vld [vmem:[#allocation3 + $0x2f] sm:$0x1]  ;;  %v1484_v35 = vld [vmem:[#allocation3 + $0x37] sm:$0x1]  ;;  %v1485_v46 = vld [vmem:[#allocation3 + $0x3f] sm:$0x1] }
 0x121   :  { %2274 = vmatpush3.bf16.msra.mxu0 %v2474_v15  ;;  %2025 = vmatprep.mubr.msk.f32.mxu0 %vm2413_vm0, %v2414_v4  ;;  %v1319_v28 = vsel %vm212_vm5, %v1318_v16, %v1317_v23  ;;  %v1495_v38 = vsel %vm200_vm1, %v1494_v27, %v1478_v20  ;;  %v1498_v39 = vrot.slane %v1481_v24, 5  ;;  %v1500_v40 = vrot.slane %v1482_v26, 4 }
 0x122   :  { %v307_v30 = vrot.slane %v293_v21, %v2684_v49  ;;  %v308_v32 = vcombine.high %v300_v22, %v300_v22  ;;  %v316_v33 = vrot.slane %v300_v22, %v2684_v49  ;;  %1652 = vst.sshfl [vmem:[%s3086_s4] sm:$0x1 pattern:$0x73625140] %v300_v22  ;;  %2275 = vmatprep.subr.bf16.mxu0 %v2412_v3  ;;  %v1502_v50 = vrot.slane %v1483_v34, 3 }
 0x123   :  { %v1321_v17 = vsel %vm215_vm6, %v1320_v11, %v1319_v28  ;;  %v1497_v48 = vsel %vm203_vm2, %v1496_v29, %v1495_v38  ;;  %v1504_v52 = vrot.slane %v1484_v35, 2  ;;  %v1506_v1 = vrot.slane %v1485_v46, 1 }
 0x124   :  { %v2714_v36 = vsel %vm218_vm7, %v1322_v53, %v1321_v17  ;;  %v309_v41 = vcombine.high %v307_v30, %v307_v30  ;;  %v323_v42 = vrot.slane %v307_v30, %v2684_v49  ;;  %v330_v44 = vrot.slane %v308_v32, %v2684_v49  ;;  %1653 = vst.sshfl [vmem:[%s3086_s4 + $0x8] sm:$0x1 pattern:$0x73625140] %v308_v32 }
 0x125   :  { %v338_v45 = vcombine.high %v316_v33, %v316_v33  ;;  %1654 = vst.sshfl [vmem:[%s3086_s4 + $0x20] sm:$0x1 pattern:$0x73625140] %v307_v30  ;;  %2277 = vmatpush3.bf16.msra.mxu0 %v2486_v19  ;;  %v1499_v59 = vsel %vm206_vm3, %v1498_v39, %v1497_v48 }
 0x126   :  { %v337_v55 = vrot.slane %v309_v41, %v2684_v49  ;;  %v339_v56 = vcombine.high %v323_v42, %v323_v42  ;;  %v340_v57 = vcombine.high %v330_v44, %v330_v44  ;;  %1655 = vst.sshfl [vmem:[%s3086_s4 + $0x28] sm:$0x1 pattern:$0x73625140] %v309_v41  ;;  %2278 = vmatprep.subr.bf16.mxu0 %v2412_v3 }
 0x127   :  { %352 = vst [vmem:[%s3086_s4 + $0x10] sm:$0x1] %v338_v45  ;;  %v1501_v60 = vsel %vm209_vm4, %v1500_v40, %v1499_v59  ;;  %v1278_v59 = vld [vmem:[%s3083_s1] sm:$0xff] }
 0x128   :  { %v341_v62 = vcombine.high %v337_v55, %v337_v55  ;;  %353 = vst [vmem:[%s3086_s4 + $0x18] sm:$0x1] %v340_v57  ;;  %356 = vst [vmem:[%s3086_s4 + $0x30] sm:$0x1] %v339_v56  ;;  %v1503_v63 = vsel %vm212_vm5, %v1502_v50, %v1501_v60  ;;  %v1279_v60 = vld [vmem:[%s3083_s1 + $0x8] sm:$0xff] }
 0x129   :  { %2280 = vmatpush3.bf16.msra.mxu0 %v2502_v25  ;;  %v1505_v2 = vsel %vm215_vm6, %v1504_v52, %v1503_v63  ;;  %v2345_v63 = vpack.c.bf16 %v1279_v60, %v1278_v59 }
 0x12a   :  { %357 = vst [vmem:[%s3086_s4 + $0x38] sm:$0x1] %v341_v62  ;;  %2281 = vmatprep.subr.bf16.mxu0 %v2412_v3  ;;  %v2751_v5 = vsel %vm218_vm7, %v1506_v1, %v1505_v2  ;;  %v1280_v62 = vld [vmem:[%s3083_s1 + $0x10] sm:$0xff]  ;;  %v1281_v1 = vld [vmem:[%s3083_s1 + $0x18] sm:$0xff] }
 0x12b   :  { %v2348_v2 = vpack.c.bf16 %v1281_v1, %v1280_v62 }
 0x12d   :  { %2283 = vmatpush3.bf16.msra.mxu0 %v2518_v31 }
 0x12e   :  { %2284 = vmatprep.subr.bf16.mxu0 %v2412_v3 }
 0x131   :  { %2286 = vmatpush3.bf16.msra.mxu0 %v2534_v37 }
 0x132   :  { %2287 = vmatprep.subr.bf16.mxu0 %v2412_v3 }
 0x135   :  { %2289 = vmatpush3.bf16.msra.mxu0 %v2550_v43 }
 0x136   :  { %2290 = vmatprep.subr.bf16.mxu0 %v2412_v3 }
 0x139   :  { %2292 = vmatpush3.bf16.msra.mxu0 %v2560_v47 }
 0x13a   :  { %2293 = vmatprep.subr.bf16.mxu0 %v2412_v3 }
 0x13d   :  { %2295 = vmatpush3.bf16.msra.mxu0 %v2573_v51 }
 0x13e   :  { %2320 = vmatprep.subr.bf16.mxu0 %v2412_v3 }
 0x1f3   :  { %v471_v6 = vpop.f32.mrb[8].mxu0 }
 0x1f4   :  { %v472_v7 = vadd.f32 %v471_v6, %v2662_v54  ;;  %v1957_v8 = vpop.f32.mrb[9].mxu0  ;;  %v1282_v6 = vld [vmem:[%s3083_s1 + $0x20] sm:$0xff] }
 0x1f6   :  { %2398 = vtanh.f32 %v472_v7  ;;  %v1283_v7 = vld [vmem:[%s3083_s1 + $0x28] sm:$0xff] }
 0x1f7   :  { %v2351_v8 = vpack.c.bf16 %v1283_v7, %v1282_v6 }
 0x200   :  { %v2399_v9 = vpop.eup %2398 }
 0x201   :  { %v477_v10 = vcombine.high %v2399_v9, %v2399_v9  ;;  %v484_v11 = vrot.slane %v2399_v9, %v2684_v49  ;;  %1991 = vmatmul.mubr.f32.vlgmr.msra.gmra.mrb[2].mxu1 %v2399_v9  ;;  %v1284_v9 = vld [vmem:[%s3083_s1 + $0x30] sm:$0xff] }
 0x202   :  { %2298 = vmatpush3.bf16.msra.mxu1 %v2474_v15  ;;  %2060 = vmatprep.mubr.msk.f32.mxu1 %vm2413_vm0, %v2414_v4 }
 0x203   :  { %v491_v0 = vrot.slane %v477_v10, %v2684_v49  ;;  %v492_v12 = vcombine.high %v484_v11, %v484_v11  ;;  %v500_v14 = vrot.slane %v484_v11, %v2684_v49  ;;  %1656 = vst.sshfl [vmem:[%s3086_s4 + $0x1] sm:$0x1 pattern:$0x73625140] %v484_v11  ;;  %2299 = vmatprep.subr.bf16.mxu1 %v2412_v3  ;;  %v1285_v10 = vld [vmem:[%s3083_s1 + $0x38] sm:$0xff] }
 0x204   :  { %v2354_v11 = vpack.c.bf16 %v1285_v10, %v1284_v9 }
 0x205   :  { %v493_v54 = vcombine.high %v491_v0, %v491_v0  ;;  %v507_v16 = vrot.slane %v491_v0, %v2684_v49  ;;  %v514_v20 = vrot.slane %v492_v12, %v2684_v49  ;;  %v522_v21 = vcombine.high %v500_v14, %v500_v14  ;;  %1657 = vst.sshfl [vmem:[%s3086_s4 + $0x9] sm:$0x1 pattern:$0x73625140] %v492_v12  ;;  %v1287_v12 = vld [vmem:[%s3083_s1 + $0x48] sm:$0xff] }
 0x206   :  { %1658 = vst.sshfl [vmem:[%s3086_s4 + $0x21] sm:$0x1 pattern:$0x73625140] %v491_v0  ;;  %2301 = vmatpush3.bf16.msra.mxu1 %v2486_v19  ;;  %v1286_v0 = vld [vmem:[%s3083_s1 + $0x40] sm:$0xff] }
 0x207   :  { %v521_v22 = vrot.slane %v493_v54, %v2684_v49  ;;  %v523_v23 = vcombine.high %v507_v16, %v507_v16  ;;  %v524_v24 = vcombine.high %v514_v20, %v514_v20  ;;  %536 = vst [vmem:[%s3086_s4 + $0x11] sm:$0x1] %v522_v21  ;;  %1659 = vst.sshfl [vmem:[%s3086_s4 + $0x29] sm:$0x1 pattern:$0x73625140] %v493_v54  ;;  %2302 = vmatprep.subr.bf16.mxu1 %v2412_v3 }
 0x208   :  { %v2357_v14 = vpack.c.bf16 %v1287_v12, %v1286_v0 }
 0x209   :  { %v525_v26 = vcombine.high %v521_v22, %v521_v22  ;;  %537 = vst [vmem:[%s3086_s4 + $0x19] sm:$0x1] %v524_v24  ;;  %540 = vst [vmem:[%s3086_s4 + $0x31] sm:$0x1] %v523_v23 }
 0x20a   :  { %2304 = vmatpush3.bf16.msra.mxu1 %v2502_v25 }
 0x20b   :  { %541 = vst [vmem:[%s3086_s4 + $0x39] sm:$0x1] %v525_v26  ;;  %2305 = vmatprep.subr.bf16.mxu1 %v2412_v3 }
 0x20e   :  { %2307 = vmatpush3.bf16.msra.mxu1 %v2518_v31 }
 0x20f   :  { %2308 = vmatprep.subr.bf16.mxu1 %v2412_v3 }
 0x212   :  { %2310 = vmatpush3.bf16.msra.mxu1 %v2534_v37 }
 0x213   :  { %2311 = vmatprep.subr.bf16.mxu1 %v2412_v3 }
 0x216   :  { %2313 = vmatpush3.bf16.msra.mxu1 %v2550_v43 }
 0x217   :  { %2314 = vmatprep.subr.bf16.mxu1 %v2412_v3 }
 0x21a   :  { %2316 = vmatpush3.bf16.msra.mxu1 %v2560_v47 }
 0x21b   :  { %2317 = vmatprep.subr.bf16.mxu1 %v2412_v3 }
 0x21e   :  { %2319 = vmatpush3.bf16.msra.mxu1 %v2573_v51 }
 0x21f   :  { %2344 = vmatprep.subr.bf16.mxu1 %v2412_v3 }
 0x2d4   :  { %v655_v27 = vpop.f32.mrb[2].mxu1 }
 0x2d5   :  { %v656_v28 = vadd.f32 %v655_v27, %v2668_v61  ;;  %v1992_v53 = vpop.f32.mrb[3].mxu1 }
 0x2d7   :  { %2400 = vtanh.f32 %v656_v28 }
 0x2e1   :  { %v2401_v29 = vpop.eup %2400 }
 0x2e2   :  { %v661_v30 = vcombine.high %v2401_v29, %v2401_v29  ;;  %v668_v32 = vrot.slane %v2401_v29, %v2684_v49  ;;  %2026 = vmatmul.mubr.f32.vlgmr.msra.gmra.mrb[10].mxu0 %v2401_v29 }
 0x2e3   :  { %2322 = vmatpush3.bf16.msra.mxu0 %v2474_v15  ;;  %2095 = vmatprep.mubr.msk.f32.mxu0 %vm2413_vm0, %v2414_v4 }
 0x2e4   :  { %v675_v33 = vrot.slane %v661_v30, %v2684_v49  ;;  %v676_v17 = vcombine.high %v668_v32, %v668_v32  ;;  %v684_v34 = vrot.slane %v668_v32, %v2684_v49  ;;  %1660 = vst.sshfl [vmem:[%s3086_s4 + $0x2] sm:$0x1 pattern:$0x73625140] %v668_v32  ;;  %2323 = vmatprep.subr.bf16.mxu0 %v2412_v3 }
 0x2e6   :  { %v677_v61 = vcombine.high %v675_v33, %v675_v33  ;;  %v691_v35 = vrot.slane %v675_v33, %v2684_v49  ;;  %v698_v38 = vrot.slane %v676_v17, %v2684_v49  ;;  %v706_v15 = vcombine.high %v684_v34, %v684_v34  ;;  %1661 = vst.sshfl [vmem:[%s3086_s4 + $0xa] sm:$0x1 pattern:$0x73625140] %v676_v17  ;;  %v1288_v17 = vld [vmem:[%s3083_s1 + $0x50] sm:$0xff]  ;;  %v1289_v34 = vld [vmem:[%s3083_s1 + $0x58] sm:$0xff] }
 0x2e7   :  { %1662 = vst.sshfl [vmem:[%s3086_s4 + $0x22] sm:$0x1 pattern:$0x73625140] %v675_v33  ;;  %2325 = vmatpush3.bf16.msra.mxu0 %v2486_v19 }
 0x2e8   :  { %v705_v39 = vrot.slane %v677_v61, %v2684_v49  ;;  %v707_v40 = vcombine.high %v691_v35, %v691_v35  ;;  %v708_v41 = vcombine.high %v698_v38, %v698_v38  ;;  %720 = vst [vmem:[%s3086_s4 + $0x12] sm:$0x1] %v706_v15  ;;  %1663 = vst.sshfl [vmem:[%s3086_s4 + $0x2a] sm:$0x1 pattern:$0x73625140] %v677_v61  ;;  %2326 = vmatprep.subr.bf16.mxu0 %v2412_v3 }
 0x2e9   :  { %v2360_v61 = vpack.c.bf16 %v1289_v34, %v1288_v17  ;;  %v1290_v35 = vld [vmem:[%s3083_s1 + $0x60] sm:$0xff]  ;;  %v1291_v38 = vld [vmem:[%s3083_s1 + $0x68] sm:$0xff] }
 0x2ea   :  { %v709_v42 = vcombine.high %v705_v39, %v705_v39  ;;  %721 = vst [vmem:[%s3086_s4 + $0x1a] sm:$0x1] %v708_v41  ;;  %724 = vst [vmem:[%s3086_s4 + $0x32] sm:$0x1] %v707_v40  ;;  %v2363_v15 = vpack.c.bf16 %v1291_v38, %v1290_v35  ;;  %v1292_v39 = vld [vmem:[%s3083_s1 + $0x70] sm:$0xff]  ;;  %v1293_v40 = vld [vmem:[%s3083_s1 + $0x78] sm:$0xff] }
 0x2eb   :  { %2328 = vmatpush3.bf16.msra.mxu0 %v2502_v25  ;;  %v2366_v41 = vpack.c.bf16 %v1293_v40, %v1292_v39 }
 0x2ec   :  { %725 = vst [vmem:[%s3086_s4 + $0x3a] sm:$0x1] %v709_v42  ;;  %2329 = vmatprep.subr.bf16.mxu0 %v2412_v3 }
 0x2ef   :  { %2331 = vmatpush3.bf16.msra.mxu0 %v2518_v31 }
 0x2f0   :  { %2332 = vmatprep.subr.bf16.mxu0 %v2412_v3 }
 0x2f3   :  { %2334 = vmatpush3.bf16.msra.mxu0 %v2534_v37 }
 0x2f4   :  { %2335 = vmatprep.subr.bf16.mxu0 %v2412_v3 }
 0x2f7   :  { %2337 = vmatpush3.bf16.msra.mxu0 %v2550_v43 }
 0x2f8   :  { %2338 = vmatprep.subr.bf16.mxu0 %v2412_v3 }
 0x2fb   :  { %2340 = vmatpush3.bf16.msra.mxu0 %v2560_v47 }
 0x2fc   :  { %2341 = vmatprep.subr.bf16.mxu0 %v2412_v3 }
 0x2ff   :  { %2343 = vmatpush3.bf16.msra.mxu0 %v2573_v51 }
 0x300   :  { %2368 = vmatprep.subr.bf16.mxu0 %v2412_v3 }
 0x3b5   :  { %v839_v19 = vpop.f32.mrb[10].mxu0 }
 0x3b6   :  { %v840_v25 = vadd.f32 %v839_v19, %v2675_v18  ;;  %v2027_v31 = vpop.f32.mrb[11].mxu0 }
 0x3b8   :  { %2402 = vtanh.f32 %v840_v25 }
 0x3c2   :  { %v2403_v37 = vpop.eup %2402 }
 0x3c3   :  { %v845_v44 = vcombine.high %v2403_v37, %v2403_v37  ;;  %v852_v45 = vrot.slane %v2403_v37, %v2684_v49  ;;  %2061 = vmatmul.mubr.f32.vlgmr.msra.gmra.mrb[4].mxu1 %v2403_v37 }
 0x3c4   :  { %2130 = vmatprep.mubr.msk.f32.mxu1 %vm2413_vm0, %v2414_v4  ;;  %2346 = vmatpush3.bf16.msra.mxu1 %v2345_v63 }
 0x3c5   :  { %v859_v43 = vrot.slane %v845_v44, %v2684_v49  ;;  %v860_v47 = vcombine.high %v852_v45, %v852_v45  ;;  %v868_v51 = vrot.slane %v852_v45, %v2684_v49  ;;  %1664 = vst.sshfl [vmem:[%s3086_s4 + $0x3] sm:$0x1 pattern:$0x73625140] %v852_v45  ;;  %2347 = vmatprep.subr.bf16.mxu1 %v2412_v3 }
 0x3c7   :  { %v861_v18 = vcombine.high %v859_v43, %v859_v43  ;;  %v875_v46 = vrot.slane %v859_v43, %v2684_v49  ;;  %v882_v48 = vrot.slane %v860_v47, %v2684_v49  ;;  %v890_v50 = vcombine.high %v868_v51, %v868_v51  ;;  %1665 = vst.sshfl [vmem:[%s3086_s4 + $0xb] sm:$0x1 pattern:$0x73625140] %v860_v47 }
 0x3c8   :  { %1666 = vst.sshfl [vmem:[%s3086_s4 + $0x23] sm:$0x1 pattern:$0x73625140] %v859_v43  ;;  %2349 = vmatpush3.bf16.msra.mxu1 %v2348_v2 }
 0x3c9   :  { %v889_v52 = vrot.slane %v861_v18, %v2684_v49  ;;  %v891_v55 = vcombine.high %v875_v46, %v875_v46  ;;  %v892_v56 = vcombine.high %v882_v48, %v882_v48  ;;  %904 = vst [vmem:[%s3086_s4 + $0x13] sm:$0x1] %v890_v50  ;;  %1667 = vst.sshfl [vmem:[%s3086_s4 + $0x2b] sm:$0x1 pattern:$0x73625140] %v861_v18  ;;  %2350 = vmatprep.subr.bf16.mxu1 %v2412_v3 }
 0x3cb   :  { %v893_v57 = vcombine.high %v889_v52, %v889_v52  ;;  %905 = vst [vmem:[%s3086_s4 + $0x1b] sm:$0x1] %v892_v56  ;;  %908 = vst [vmem:[%s3086_s4 + $0x33] sm:$0x1] %v891_v55 }
 0x3cc   :  { %2352 = vmatpush3.bf16.msra.mxu1 %v2351_v8 }
 0x3cd   :  { %909 = vst [vmem:[%s3086_s4 + $0x3b] sm:$0x1] %v893_v57  ;;  %2353 = vmatprep.subr.bf16.mxu1 %v2412_v3 }
 0x3d0   :  { %2355 = vmatpush3.bf16.msra.mxu1 %v2354_v11 }
 0x3d1   :  { %2356 = vmatprep.subr.bf16.mxu1 %v2412_v3 }
 0x3d4   :  { %2358 = vmatpush3.bf16.msra.mxu1 %v2357_v14 }
 0x3d5   :  { %2359 = vmatprep.subr.bf16.mxu1 %v2412_v3 }
 0x3d8   :  { %2361 = vmatpush3.bf16.msra.mxu1 %v2360_v61 }
 0x3d9   :  { %2362 = vmatprep.subr.bf16.mxu1 %v2412_v3 }
 0x3dc   :  { %2364 = vmatpush3.bf16.msra.mxu1 %v2363_v15 }
 0x3dd   :  { %2365 = vmatprep.subr.bf16.mxu1 %v2412_v3 }
 0x3e0   :  { %2367 = vmatpush3.bf16.msra.mxu1 %v2366_v41 }
 0x496   :  { %v1023_v54 = vpop.f32.mrb[4].mxu1 }
 0x497   :  { %v1024_v16 = vadd.f32 %v1023_v54, %v2689_v58  ;;  %v2062_v20 = vpop.f32.mrb[5].mxu1 }
 0x499   :  { %2404 = vtanh.f32 %v1024_v16 }
 0x4a3   :  { %v2405_v21 = vpop.eup %2404 }
 0x4a4   :  { %v1029_v22 = vcombine.high %v2405_v21, %v2405_v21  ;;  %v1036_v23 = vrot.slane %v2405_v21, %v2684_v49  ;;  %2096 = vmatmul.mubr.f32.vlgmr.msra.gmra.mrb[12].mxu0 %v2405_v21 }
 0x4a5   :  { %2370 = vmatpush3.bf16.msra.mxu0 %v2345_v63  ;;  %2165 = vmatprep.mubr.msk.f32.mxu0 %vm2413_vm0, %v2414_v4 }
 0x4a6   :  { %v1043_v24 = vrot.slane %v1029_v22, %v2684_v49  ;;  %v1044_v26 = vcombine.high %v1036_v23, %v1036_v23  ;;  %v1052_v27 = vrot.slane %v1036_v23, %v2684_v49  ;;  %1668 = vst.sshfl [vmem:[%s3086_s4 + $0x4] sm:$0x1 pattern:$0x73625140] %v1036_v23  ;;  %2371 = vmatprep.subr.bf16.mxu0 %v2412_v3 }
 0x4a8   :  { %v1045_v58 = vcombine.high %v1043_v24, %v1043_v24  ;;  %v1059_v28 = vrot.slane %v1043_v24, %v2684_v49  ;;  %v1066_v53 = vrot.slane %v1044_v26, %v2684_v49  ;;  %v1074_v29 = vcombine.high %v1052_v27, %v1052_v27  ;;  %1669 = vst.sshfl [vmem:[%s3086_s4 + $0xc] sm:$0x1 pattern:$0x73625140] %v1044_v26 }
 0x4a9   :  { %1670 = vst.sshfl [vmem:[%s3086_s4 + $0x24] sm:$0x1 pattern:$0x73625140] %v1043_v24  ;;  %2373 = vmatpush3.bf16.msra.mxu0 %v2348_v2 }
 0x4aa   :  { %v1073_v4 = vrot.slane %v1045_v58, %v2684_v49  ;;  %v1075_v30 = vcombine.high %v1059_v28, %v1059_v28  ;;  %v1076_v32 = vcombine.high %v1066_v53, %v1066_v53  ;;  %1088 = vst [vmem:[%s3086_s4 + $0x14] sm:$0x1] %v1074_v29  ;;  %1671 = vst.sshfl [vmem:[%s3086_s4 + $0x2c] sm:$0x1 pattern:$0x73625140] %v1045_v58  ;;  %2374 = vmatprep.subr.bf16.mxu0 %v2412_v3 }
 0x4ac   :  { %v1077_v33 = vcombine.high %v1073_v4, %v1073_v4  ;;  %1089 = vst [vmem:[%s3086_s4 + $0x1c] sm:$0x1] %v1076_v32  ;;  %1092 = vst [vmem:[%s3086_s4 + $0x34] sm:$0x1] %v1075_v30 }
 0x4ad   :  { %2376 = vmatpush3.bf16.msra.mxu0 %v2351_v8 }
 0x4ae   :  { %1093 = vst [vmem:[%s3086_s4 + $0x3c] sm:$0x1] %v1077_v33  ;;  %2377 = vmatprep.subr.bf16.mxu0 %v2412_v3 }
 0x4b1   :  { %2379 = vmatpush3.bf16.msra.mxu0 %v2354_v11 }
 0x4b2   :  { %2380 = vmatprep.subr.bf16.mxu0 %v2412_v3 }
 0x4b5   :  { %2382 = vmatpush3.bf16.msra.mxu0 %v2357_v14 }
 0x4b6   :  { %2383 = vmatprep.subr.bf16.mxu0 %v2412_v3 }
 0x4b9   :  { %2385 = vmatpush3.bf16.msra.mxu0 %v2360_v61 }
 0x4ba   :  { %2386 = vmatprep.subr.bf16.mxu0 %v2412_v3 }
 0x4bd   :  { %2388 = vmatpush3.bf16.msra.mxu0 %v2363_v15 }
 0x4be   :  { %2389 = vmatprep.subr.bf16.mxu0 %v2412_v3 }
 0x4c1   :  { %2391 = vmatpush3.bf16.msra.mxu0 %v2366_v41 }
 0x577   :  { %v1207_v42 = vpop.f32.mrb[12].mxu0 }
 0x578   :  { %v1208_v19 = vadd.f32 %v1207_v42, %v2697_v13  ;;  %v2097_v25 = vpop.f32.mrb[13].mxu0 }
 0x57a   :  { %2406 = vtanh.f32 %v1208_v19 }
 0x584   :  { %v2407_v31 = vpop.eup %2406 }
 0x585   :  { %v1213_v37 = vcombine.high %v2407_v31, %v2407_v31  ;;  %v1220_v44 = vrot.slane %v2407_v31, %v2684_v49  ;;  %2131 = vmatmul.mubr.f32.vlgmr.msra.gmra.mrb[6].mxu1 %v2407_v31 }
 0x587   :  { %v1227_v45 = vrot.slane %v1213_v37, %v2684_v49  ;;  %v1228_v43 = vcombine.high %v1220_v44, %v1220_v44  ;;  %v1236_v47 = vrot.slane %v1220_v44, %v2684_v49  ;;  %1672 = vst.sshfl [vmem:[%s3086_s4 + $0x5] sm:$0x1 pattern:$0x73625140] %v1220_v44 }
 0x589   :  { %v1229_v3 = vcombine.high %v1227_v45, %v1227_v45  ;;  %v1243_v51 = vrot.slane %v1227_v45, %v2684_v49  ;;  %v1250_v13 = vrot.slane %v1228_v43, %v2684_v49  ;;  %v1258_v18 = vcombine.high %v1236_v47, %v1236_v47  ;;  %1673 = vst.sshfl [vmem:[%s3086_s4 + $0xd] sm:$0x1 pattern:$0x73625140] %v1228_v43 }
 0x58a   :  { %1674 = vst.sshfl [vmem:[%s3086_s4 + $0x25] sm:$0x1 pattern:$0x73625140] %v1227_v45 }
 0x58b   :  { %v1257_v46 = vrot.slane %v1229_v3, %v2684_v49  ;;  %v1259_v48 = vcombine.high %v1243_v51, %v1243_v51  ;;  %v1260_v50 = vcombine.high %v1250_v13, %v1250_v13  ;;  %1272 = vst [vmem:[%s3086_s4 + $0x15] sm:$0x1] %v1258_v18  ;;  %1675 = vst.sshfl [vmem:[%s3086_s4 + $0x2d] sm:$0x1 pattern:$0x73625140] %v1229_v3 }
 0x58d   :  { %v1261_v52 = vcombine.high %v1257_v46, %v1257_v46  ;;  %1273 = vst [vmem:[%s3086_s4 + $0x1d] sm:$0x1] %v1260_v50  ;;  %1276 = vst [vmem:[%s3086_s4 + $0x35] sm:$0x1] %v1259_v48 }
 0x58f   :  { %1277 = vst [vmem:[%s3086_s4 + $0x3d] sm:$0x1] %v1261_v52 }
 0x658   :  { %v1391_v55 = vpop.f32.mrb[6].mxu1 }
 0x659   :  { %v1392_v56 = vadd.f32 %v1391_v55, %v2714_v36  ;;  %v2132_v57 = vpop.f32.mrb[7].mxu1 }
 0x65b   :  { %2408 = vtanh.f32 %v1392_v56 }
 0x665   :  { %v2409_v59 = vpop.eup %2408 }
 0x666   :  { %v1397_v60 = vcombine.high %v2409_v59, %v2409_v59  ;;  %v1404_v62 = vrot.slane %v2409_v59, %v2684_v49  ;;  %2166 = vmatmul.mubr.f32.vlgmr.msra.gmra.mrb[14].mxu0 %v2409_v59 }
 0x668   :  { %v1411_v63 = vrot.slane %v1397_v60, %v2684_v49  ;;  %v1412_v1 = vcombine.high %v1404_v62, %v1404_v62  ;;  %v1420_v2 = vrot.slane %v1404_v62, %v2684_v49  ;;  %1676 = vst.sshfl [vmem:[%s3086_s4 + $0x6] sm:$0x1 pattern:$0x73625140] %v1404_v62 }
 0x66a   :  { %v1413_v6 = vcombine.high %v1411_v63, %v1411_v63  ;;  %v1427_v7 = vrot.slane %v1411_v63, %v2684_v49  ;;  %v1434_v36 = vrot.slane %v1412_v1, %v2684_v49  ;;  %v1442_v8 = vcombine.high %v1420_v2, %v1420_v2  ;;  %1677 = vst.sshfl [vmem:[%s3086_s4 + $0xe] sm:$0x1 pattern:$0x73625140] %v1412_v1 }
 0x66b   :  { %1678 = vst.sshfl [vmem:[%s3086_s4 + $0x26] sm:$0x1 pattern:$0x73625140] %v1411_v63 }
 0x66c   :  { %v1441_v9 = vrot.slane %v1413_v6, %v2684_v49  ;;  %v1443_v10 = vcombine.high %v1427_v7, %v1427_v7  ;;  %v1444_v11 = vcombine.high %v1434_v36, %v1434_v36  ;;  %1456 = vst [vmem:[%s3086_s4 + $0x16] sm:$0x1] %v1442_v8  ;;  %1679 = vst.sshfl [vmem:[%s3086_s4 + $0x2e] sm:$0x1 pattern:$0x73625140] %v1413_v6 }
 0x66e   :  { %v1445_v0 = vcombine.high %v1441_v9, %v1441_v9  ;;  %1457 = vst [vmem:[%s3086_s4 + $0x1e] sm:$0x1] %v1444_v11  ;;  %1460 = vst [vmem:[%s3086_s4 + $0x36] sm:$0x1] %v1443_v10 }
 0x670   :  { %1461 = vst [vmem:[%s3086_s4 + $0x3e] sm:$0x1] %v1445_v0 }
 0x739   :  { %v1575_v12 = vpop.f32.mrb[14].mxu0 }
 0x73a   :  { %v1576_v14 = vadd.f32 %v1575_v12, %v2751_v5  ;;  %v2167_v54 = vpop.f32.mrb[15].mxu0 }
 0x73c   :  { %2410 = vtanh.f32 %v1576_v14 }
 0x746   :  { %v2411_v16 = vpop.eup %2410 }
 0x747   :  { %v1581_v20 = vcombine.high %v2411_v16, %v2411_v16  ;;  %v1588_v21 = vrot.slane %v2411_v16, %v2684_v49 }
 0x749   :  { %v1595_v22 = vrot.slane %v1581_v20, %v2684_v49  ;;  %v1596_v23 = vcombine.high %v1588_v21, %v1588_v21  ;;  %v1604_v24 = vrot.slane %v1588_v21, %v2684_v49  ;;  %1680 = vst.sshfl [vmem:[%s3086_s4 + $0x7] sm:$0x1 pattern:$0x73625140] %v1588_v21 }
 0x74b   :  { %v1597_v26 = vcombine.high %v1595_v22, %v1595_v22  ;;  %v1611_v27 = vrot.slane %v1595_v22, %v2684_v49  ;;  %v1618_v5 = vrot.slane %v1596_v23, %v2684_v49  ;;  %v1626_v58 = vcombine.high %v1604_v24, %v1604_v24  ;;  %1681 = vst.sshfl [vmem:[%s3086_s4 + $0xf] sm:$0x1 pattern:$0x73625140] %v1596_v23 }
 0x74c   :  { %1682 = vst.sshfl [vmem:[%s3086_s4 + $0x27] sm:$0x1 pattern:$0x73625140] %v1595_v22 }
 0x74d   :  { %v1625_v28 = vrot.slane %v1597_v26, %v2684_v49  ;;  %v1627_v53 = vcombine.high %v1611_v27, %v1611_v27  ;;  %v1628_v29 = vcombine.high %v1618_v5, %v1618_v5  ;;  %1640 = vst [vmem:[%s3086_s4 + $0x17] sm:$0x1] %v1626_v58  ;;  %1683 = vst.sshfl [vmem:[%s3086_s4 + $0x2f] sm:$0x1 pattern:$0x73625140] %v1597_v26 }
 0x74f   :  { %v1629_v4 = vcombine.high %v1625_v28, %v1625_v28  ;;  %1641 = vst [vmem:[%s3086_s4 + $0x1f] sm:$0x1] %v1628_v29  ;;  %1644 = vst [vmem:[%s3086_s4 + $0x37] sm:$0x1] %v1627_v53 }
 0x751   :  { %1645 = vst [vmem:[%s3086_s4 + $0x3f] sm:$0x1] %v1629_v4 }

</bundles_post_ra>
